<compile_context>
chip_gen: v5e
topology: v5e:2x2
jax: 0.10.0
libtpu: 0.0.40
codegen_flags: <defaults>
</compile_context>

<pallas_src>
import functools

import jax
import jax.numpy as jnp
import numpy as np
from jax.experimental import pallas as pl
from jax.experimental.pallas import tpu as pltpu


# ----------------------------- Pallas kernel --------------------------------

def _bi_attn_kernel(
    # inputs
    v_ref, l_ref, maskadd_ref,
    lnvw_ref, lnvb_ref, lnlw_ref, lnlb_ref,
    wqv_ref, bqv_ref, wkl_ref, bkl_ref,
    wov_ref, bov_ref, wol_ref, bol_ref,
    gv_ref, gl_ref,
    # outputs
    vout_ref, lout_ref,
    # scratch (persist across the tiled vision axis)
    lln_ref, k_ref, vl_ref, m_ref, lsum_ref, accl_ref, ov_ref,
    *, num_heads, head_dim, heads_per_group, t_valid, tile_t):

    H, d = num_heads, head_dim
    hpg = heads_per_group
    gw = hpg * d                       # lane width of one head group
    n_groups = H // hpg
    E = H * d
    t_idx = pl.program_id(1)
    nt = pl.num_programs(1)

    def layer_norm(x, w, b):
        mu = jnp.mean(x, axis=-1, keepdims=True)
        var = jnp.mean(jnp.square(x - mu), axis=-1, keepdims=True)
        return (x - mu) * jax.lax.rsqrt(var + 1e-5) * w + b

    def cat(parts):
        return parts[0] if len(parts) == 1 else jnp.concatenate(parts, axis=-1)

    # ---- once per batch: language-side LN + fused K|V_l projection + flash init ----
    @pl.when(t_idx == 0)
    def _init():
        l_ln = layer_norm(l_ref[0].astype(jnp.float32), lnlw_ref[...], lnlb_ref[...])
        lln_ref[...] = l_ln
        l_bf = l_ln.astype(jnp.bfloat16)
        kvl = (jnp.dot(l_bf, wkl_ref[...], preferred_element_type=jnp.float32)
               + bkl_ref[...])                                     # (S, 2E)
        k_ref[...] = kvl[:, :E].astype(jnp.bfloat16)
        vl_ref[...] = kvl[:, E:].astype(jnp.bfloat16)
        m_ref[...] = jnp.full(m_ref.shape, -jnp.inf, jnp.float32)
        lsum_ref[...] = jnp.zeros(lsum_ref.shape, jnp.float32)
        accl_ref[...] = jnp.zeros(accl_ref.shape, jnp.float32)

    # ---- per vision tile: vision path + language-side flash accumulation ----------
    v_ln = layer_norm(v_ref[0].astype(jnp.float32), lnvw_ref[...], lnvb_ref[...])
    v_bf = v_ln.astype(jnp.bfloat16)

    # Fused Q|V_v projection (scale already folded into the Q half of wqv / bqv).
    qvv = (jnp.dot(v_bf, wqv_ref[...], preferred_element_type=jnp.float32)
           + bqv_ref[...])                                         # (tT, 2E)
    q = qvv[:, :E].astype(jnp.bfloat16)
    vv = qvv[:, E:].astype(jnp.bfloat16)

    k_all = k_ref[...]                                             # (S, E) bf16
    vl_all = vl_ref[...]                                           # (S, E) bf16

    # NOTE: maskadd matches torch masked_fill-then-add: kept positions get +mask
    # (uniform per-row shift, softmax-invariant for 0/1 masks), masked get -9e15.
    # Precomputed outside the kernel (per-tile compare/select removed).
    mask_add = maskadd_ref[0]                                      # (1, S) f32

    # Load the flash running stats once per tile; store once at the end of the tile.
    m_all = m_ref[...]                                             # (S, H) f32
    l_all = lsum_ref[...]                                          # (S, H) f32

    # Row-validity mask for zero-padded vision tokens (only when T % tile_t != 0).
    pad = (t_valid % tile_t) != 0
    if pad:
        row_id = t_idx * tile_t + jax.lax.broadcasted_iota(jnp.int32, (1, tile_t), 1)
        row_valid = row_id < t_valid                               # (1, tT) bool

    dn_nt = (((1,), (1,)), ((), ()))   # A @ B^T (contract last dims)
    dn_nn = (((1,), (0,)), ((), ()))   # A @ B

    m_cols, l_cols = [], []
    out_v_direct = None
    for g in range(n_groups):
        gsl = slice(g * gw, (g + 1) * gw)
        accl_grp = accl_ref[:, gsl]                                # (S, gw) lane-dense load
        ov_parts, accl_parts = [], []
        for hl in range(hpg):
            h = g * hpg + hl
            hsl = slice(h * d, (h + 1) * d)
            lsl = slice(hl * d, (hl + 1) * d)
            q_h = q[:, hsl]                                        # (tT, d) bf16
            k_h = k_all[:, hsl]                                    # (S, d)  bf16
            vv_h = vv[:, hsl]                                      # (tT, d) bf16
            vl_h = vl_all[:, hsl]                                  # (S, d)  bf16

            # -- vision-side attention: softmax over language tokens (S resident) --
            aw = jax.lax.dot_general(q_h, k_h, dn_nt,
                                     preferred_element_type=jnp.float32)   # (tT, S)
            aw = jnp.clip(aw, -50000.0, 50000.0)      # clamp under/overflow
            logits_v = aw + mask_add
            mv = jnp.max(logits_v, axis=-1, keepdims=True)
            pv = jnp.exp(logits_v - mv)
            denom_v = jnp.sum(pv, axis=-1, keepdims=True)
            ovh = jax.lax.dot_general(pv.astype(jnp.bfloat16), vl_h, dn_nn,
                                      preferred_element_type=jnp.float32)  # (tT, d)
            ov_parts.append((ovh * (1.0 / denom_v)).astype(jnp.bfloat16))

            # -- language-side attention: flash-style softmax over vision tokens --
            # Logits recomputed in (S, tT) orientation with a second small MXU matmul
            # instead of an XLU transpose of the probabilities.
            # TODO(synk): switch to an XLU transpose of `aw` if profiling shows the
            #             MXU (not XLU) is the saturating unit on v6e/v7x.
            aw_t = jax.lax.dot_general(k_h, q_h, dn_nt,
                                       preferred_element_type=jnp.float32)  # (S, tT)
            aw_t = jnp.clip(aw_t, -50000.0, 50000.0)
            # (torch's second clamp after max-subtraction is a numerical no-op)
            if pad:
                aw_t = jnp.where(row_valid, aw_t, -jnp.inf)
            m_old = m_all[:, h:h + 1]                              # (S, 1)
            m_new = jnp.maximum(m_old, jnp.max(aw_t, axis=-1, keepdims=True))
            alpha = jnp.exp(m_old - m_new)
            p_l = jnp.exp(aw_t - m_new)                            # (S, tT)
            l_cols.append(alpha * l_all[:, h:h + 1]
                          + jnp.sum(p_l, axis=-1, keepdims=True))
            m_cols.append(m_new)
            accl_parts.append(alpha * accl_grp[:, lsl] + jax.lax.dot_general(
                p_l.astype(jnp.bfloat16), vv_h, dn_nn,
                preferred_element_type=jnp.float32))               # (S, d)

        # Lane-dense group-slab stores (gw = min(E, 128) lanes).
        ov_g = cat(ov_parts)                                       # (tT, gw) bf16
        accl_ref[:, gsl] = cat(accl_parts)                         # (S, gw)  f32
        if n_groups == 1:
            out_v_direct = ov_g
        else:
            ov_ref[:, gsl] = ov_g

    # Single stores of the flash running stats (instead of per-head 1-lane RMWs).
    m_ref[...] = cat(m_cols)
    lsum_ref[...] = cat(l_cols)

    out_v = out_v_direct if n_groups == 1 else ov_ref[...]         # (tT, E) bf16
    delta_v = (jnp.dot(out_v, wov_ref[...], preferred_element_type=jnp.float32)
               + bov_ref[...])
    # Residual uses the post-LayerNorm v (matches the torch block).
    vout_ref[0] = v_ln + gv_ref[...] * delta_v

    # ---- once per batch, after the last vision tile: language outputs -------------
    @pl.when(t_idx == nt - 1)
    def _finalize():
        inv = 1.0 / lsum_ref[...]                                  # (S, H) f32
        s_dim = inv.shape[0]
        for g in range(n_groups):
            gsl = slice(g * gw, (g + 1) * gw)
            cols = [jnp.broadcast_to(inv[:, h:h + 1], (s_dim, d))
                    for h in range(g * hpg, (g + 1) * hpg)]
            # k_ref is dead for this batch after the last tile -> reuse it as the
            # (S, E) bf16 staging buffer for attn_output_l (re-initialized at the
            # next batch's t == 0 before any use).
            k_ref[:, gsl] = (accl_ref[:, gsl] * cat(cols)).astype(jnp.bfloat16)
        delta_l = (jnp.dot(k_ref[...], wol_ref[...], preferred_element_type=jnp.float32)
                   + bol_ref[...])
        lout_ref[0] = lln_ref[...] + gl_ref[...] * delta_l


# ------------------------------- wrapper -------------------------------------

PARAM_ORDER = ["ln_v_w", "ln_v_b", "ln_l_w", "ln_l_b",
               "wqv_t", "bqv", "wkl_t", "bkl",
               "wov_t", "bov", "wol_t", "bol",
               "gamma_v", "gamma_l"]


def bi_attention_block(v, l, attention_mask_l, kparams, *,
                       num_heads, head_dim, tile_t=None, vmem_budget_bytes=None):
    B, T, Vd = v.shape
    _, S, Ld = l.shape
    E = num_heads * head_dim

    # Head lane-grouping: group width = min(E, 128) lanes.
    hpg = 1 if head_dim >= 128 else min(num_heads, max(1, 128 // head_dim))
    while num_heads % hpg:
        hpg -= 1

    param_list = [kparams[k] for k in PARAM_ORDER]

    # ---- VMEM budget (derived per device generation) ----
    if vmem_budget_bytes is None:
        cap = 64 * 1024 * 1024          # conservative fallback (v7x per-TC capacity)
        try:
            cap = int(pltpu.get_tpu_info().vmem_capacity_bytes)
        except Exception:
            pass
        vmem_budget_bytes = int(cap * 3 // 4)

    def _param_bytes():
        return sum(int(np.prod(p.shape)) * p.dtype.itemsize for p in param_list)

    def _footprint(tt):
        scratch = (S * Ld * 4                       # post-LN l (residual base)
                   + 2 * S * E * 2                  # K, V_l (bf16)
                   + 2 * S * num_heads * 4          # running max / denom
                   + S * E * 4                      # running numerator
                   + tt * E * 2)                    # vision-output staging (bf16)
        io = 2 * (tt * Vd * 4                       # v tile (double-buffered)
                  + S * Ld * 4 + S * 4              # l, mask_add
                  + tt * Vd * 4 + S * Ld * 4)       # v out tile, l out
        return scratch + io + 2 * _param_bytes()

    # ---- tile_t selection (largest candidate <= T that fits the budget) ----
    if tile_t is None:
        cands = [c for c in (1024, 512, 256, 128, 64, 32, 16, 8) if c <= max(8, T)]
        if not cands:
            cands = [8]
        tile_t = cands[-1]
        for c in cands:
            if _footprint(c) <= vmem_budget_bytes:
                tile_t = c
                break

    nt = pl.cdiv(T, tile_t)
    t_pad = nt * tile_t
    if t_pad != T:
        # Zero-pad the vision tokens; padded rows are masked out of the language-side
        # softmax inside the kernel and sliced off the vision output below.
        v = jnp.pad(v, ((0, 0), (0, t_pad - T), (0, 0)))

    vmem_limit = int(min(max(32 * 1024 * 1024, _footprint(tile_t) * 2),
                         max(vmem_budget_bytes, 32 * 1024 * 1024)))

    # masked_fill(-9e15) + add precomputed once (removes per-tile compare/select).
    mask3 = attention_mask_l.reshape(B, 1, S).astype(jnp.float32)
    mask_add = jnp.where(mask3 == 0.0, -9e15, mask3)

    def full_spec(x):
        return pl.BlockSpec(x.shape, lambda b, t, _nd=x.ndim: (0,) * _nd)

    in_specs = [
        pl.BlockSpec((1, tile_t, Vd), lambda b, t: (b, t, 0)),   # v tile
        pl.BlockSpec((1, S, Ld), lambda b, t: (b, 0, 0)),        # l (resident over t)
        pl.BlockSpec((1, 1, S), lambda b, t: (b, 0, 0)),         # precomputed mask_add
    ] + [full_spec(p) for p in param_list]

    out_specs = [
        pl.BlockSpec((1, tile_t, Vd), lambda b, t: (b, t, 0)),   # v out (per tile)
        pl.BlockSpec((1, S, Ld), lambda b, t: (b, 0, 0)),        # l out (written at last t)
    ]

    scratch_shapes = [
        pltpu.VMEM((S, Ld), jnp.float32),           # LayerNormed l (residual base)
        pltpu.VMEM((S, E), jnp.bfloat16),           # K (reused as out_l staging at finalize)
        pltpu.VMEM((S, E), jnp.bfloat16),           # V_l
        pltpu.VMEM((S, num_heads), jnp.float32),    # running max   (language softmax)
        pltpu.VMEM((S, num_heads), jnp.float32),    # running denom (language softmax)
        pltpu.VMEM((S, E), jnp.float32),            # running numerator (language out)
        pltpu.VMEM((tile_t, E), jnp.bfloat16),      # vision attn-output staging
    ]

    kernel = functools.partial(_bi_attn_kernel,
                               num_heads=num_heads, head_dim=head_dim,
                               heads_per_group=hpg, t_valid=T, tile_t=tile_t)
    v_out, l_out = pl.pallas_call(
        kernel,
        grid=(B, nt),
        in_specs=in_specs,
        out_specs=out_specs,
        out_shape=[jax.ShapeDtypeStruct((B, t_pad, Vd), jnp.float32),
                   jax.ShapeDtypeStruct((B, S, Ld), jnp.float32)],
        scratch_shapes=scratch_shapes,
        compiler_params=pltpu.CompilerParams(
            # t must remain "arbitrary": the language-side flash state in scratch
            # depends on the vision tiles of one batch running in order.
            dimension_semantics=("parallel", "arbitrary"),
            vmem_limit_bytes=vmem_limit),
    )(v, l, mask_add, *param_list)

    if t_pad != T:
        v_out = v_out[:, :T, :]
    return v_out, l_out


# -------------------------- parameters (torch-style) ---------------------------

def xavier_uniform(key, out_dim, in_dim):
    a = float(np.sqrt(6.0 / (in_dim + out_dim)))
    return jax.random.uniform(key, (out_dim, in_dim), jnp.float32, -a, a)


def init_params(key, v_dim, l_dim, embed_dim, init_values=1e-4):
    ks = jax.random.split(key, 6)
    return {
        "ln_v_w": jnp.ones((v_dim,), jnp.float32),
        "ln_v_b": jnp.zeros((v_dim,), jnp.float32),
        "ln_l_w": jnp.ones((l_dim,), jnp.float32),
        "ln_l_b": jnp.zeros((l_dim,), jnp.float32),
        "wq": xavier_uniform(ks[0], embed_dim, v_dim),
        "bq": jnp.zeros((embed_dim,), jnp.float32),
        "wk": xavier_uniform(ks[1], embed_dim, l_dim),
        "bk": jnp.zeros((embed_dim,), jnp.float32),
        "wvv": xavier_uniform(ks[2], embed_dim, v_dim),
        "bvv": jnp.zeros((embed_dim,), jnp.float32),
        "wvl": xavier_uniform(ks[3], embed_dim, l_dim),
        "bvl": jnp.zeros((embed_dim,), jnp.float32),
        "wov": xavier_uniform(ks[4], v_dim, embed_dim),
        "bov": jnp.zeros((v_dim,), jnp.float32),
        "wol": xavier_uniform(ks[5], l_dim, embed_dim),
        "bol": jnp.zeros((l_dim,), jnp.float32),
        "gamma_v": jnp.full((v_dim,), init_values, jnp.float32),
        "gamma_l": jnp.full((l_dim,), init_values, jnp.float32),
    }


def prepare_kernel_params(p, head_dim):
    """One-time host-side prep: transpose weights to (in, out), fold 1/sqrt(d) into the
    query projection, fuse Q|V_v and K|V_l projection weights, cast matmul weights to
    bf16 (intentional: bf16 MXU operands with f32 accumulation)."""
    scale = head_dim ** (-0.5)
    bf = jnp.bfloat16

    def row(x):
        return jnp.asarray(x, jnp.float32).reshape(1, -1)

    wqv = jnp.concatenate([p["wq"].T * scale, p["wvv"].T], axis=1).astype(bf)  # (Vd, 2E)
    bqv = jnp.concatenate([row(p["bq"]) * scale, row(p["bvv"])], axis=1)
    wkl = jnp.concatenate([p["wk"].T, p["wvl"].T], axis=1).astype(bf)          # (Ld, 2E)
    bkl = jnp.concatenate([row(p["bk"]), row(p["bvl"])], axis=1)

    return {
        "ln_v_w": row(p["ln_v_w"]), "ln_v_b": row(p["ln_v_b"]),
        "ln_l_w": row(p["ln_l_w"]), "ln_l_b": row(p["ln_l_b"]),
        "wqv_t": wqv, "bqv": bqv,
        "wkl_t": wkl, "bkl": bkl,
        "wov_t": p["wov"].T.astype(bf), "bov": row(p["bov"]),
        "wol_t": p["wol"].T.astype(bf), "bol": row(p["bol"]),
        "gamma_v": row(p["gamma_v"]), "gamma_l": row(p["gamma_l"]),
    }


# ------------------------------ pure-JAX reference -----------------------------

def reference(v, l, attention_mask_l, p, num_heads, head_dim):
    """Faithful f32 port of the PyTorch module (eval mode)."""
    B, T, _ = v.shape
    _, S, _ = l.shape
    E = num_heads * head_dim
    scale = head_dim ** (-0.5)

    def ln(x, w, b):
        mu = jnp.mean(x, -1, keepdims=True)
        var = jnp.mean(jnp.square(x - mu), -1, keepdims=True)
        return (x - mu) / jnp.sqrt(var + 1e-5) * w + b

    v = ln(v, p["ln_v_w"], p["ln_v_b"])
    l = ln(l, p["ln_l_w"], p["ln_l_b"])

    q = (v @ p["wq"].T + p["bq"]) * scale
    k = l @ p["wk"].T + p["bk"]
    vv = v @ p["wvv"].T + p["bvv"]
    vl = l @ p["wvl"].T + p["bvl"]

    def split(x, n):
        return x.reshape(B, n, num_heads, head_dim).transpose(0, 2, 1, 3)

    qh, kh, vvh, vlh = split(q, T), split(k, S), split(vv, T), split(vl, S)
    aw = jnp.einsum('bhqd,bhkd->bhqk', qh, kh)
    aw = jnp.clip(aw, -50000.0, 50000.0)

    aw_t = jnp.swapaxes(aw, 2, 3)
    aw_l = aw_t - jnp.max(aw_t, axis=-1, keepdims=True)
    aw_l = jnp.clip(aw_l, -50000.0, 50000.0)
    aw_l = jax.nn.softmax(aw_l, axis=-1)

    mask_add = jnp.where(attention_mask_l == 0, -9e15,
                         attention_mask_l)[:, None, None, :]
    aw_v = jax.nn.softmax(aw + mask_add, axis=-1)

    ov = jnp.einsum('bhqk,bhkd->bhqd', aw_v, vlh).transpose(0, 2, 1, 3).reshape(B, T, E)
    ol = jnp.einsum('bhkq,bhqd->bhkd', aw_l, vvh).transpose(0, 2, 1, 3).reshape(B, S, E)

    dv = ov @ p["wov"].T + p["bov"]
    dl = ol @ p["wol"].T + p["bol"]
    return v + p["gamma_v"] * dv, l + p["gamma_l"] * dl


# ---------------------------------- main ---------------------------------------

if __name__ == "__main__":
    num_heads, head_dim = 4, 8
    v_dim = l_dim = 32
    embed_dim = num_heads * head_dim

    key = jax.random.PRNGKey(0)
    kv, kl, kp = jax.random.split(key, 3)

    # init_values bumped from 1e-4 so the attention deltas are visible against the
    # LayerNorm residual in the numerical check.
    params = init_params(kp, v_dim, l_dim, embed_dim, init_values=0.1)
    kparams = prepare_kernel_params(params, head_dim)

    # --- case 1: T divisible by tile_t, multi-tile flash accumulation ---
    B, T, S = 2, 64, 16
    v = jax.random.normal(kv, (B, T, v_dim), jnp.float32)
    l = jax.random.normal(kl, (B, S, l_dim), jnp.float32)
    mask = jnp.ones((B, S), jnp.float32).at[0, 12:].set(0.0).at[1, 9:].set(0.0)

    v_out, l_out = bi_attention_block(v, l, mask, kparams,
                                      num_heads=num_heads, head_dim=head_dim,
                                      tile_t=16)
    jax.block_until_ready((v_out, l_out))
    v_ref_out, l_ref_out = reference(v, l, mask, params, num_heads, head_dim)
    # bf16 MXU operands (incl. bf16 softmax probabilities) vs f32 reference -> 2e-2 tol.
    np.testing.assert_allclose(np.asarray(v_out), np.asarray(v_ref_out),
                               atol=2e-2, rtol=2e-2)
    np.testing.assert_allclose(np.asarray(l_out), np.asarray(l_ref_out),
                               atol=2e-2, rtol=2e-2)

    # --- case 2: T not divisible by the auto-selected tile_t -> padded + row-masked ---
    B2, T2 = 1, 50
    v2, l2, m2 = v[:B2, :T2], l[:B2], mask[:B2]
    v_out2, l_out2 = bi_attention_block(v2, l2, m2, kparams,
                                        num_heads=num_heads, head_dim=head_dim)
    jax.block_until_ready((v_out2, l_out2))
    v_ref2, l_ref2 = reference(v2, l2, m2, params, num_heads, head_dim)
    np.testing.assert_allclose(np.asarray(v_out2), np.asarray(v_ref2),
                               atol=2e-2, rtol=2e-2)
    np.testing.assert_allclose(np.asarray(l_out2), np.asarray(l_ref2),
                               atol=2e-2, rtol=2e-2)

    print("KERNEL_OK")
</pallas_src>

<mosaic_0001>
module attributes {stable_mosaic.version = 11 : i64} {
  func.func @_bi_attn_kernel(%arg0: i32, %arg1: i32, %arg2: memref<1x16x32xf32, #tpu.memory_space<vmem>>, %arg3: memref<1x16x32xf32, #tpu.memory_space<vmem>>, %arg4: memref<1x1x16xf32, #tpu.memory_space<vmem>>, %arg5: memref<1x32xf32, #tpu.memory_space<vmem>>, %arg6: memref<1x32xf32, #tpu.memory_space<vmem>>, %arg7: memref<1x32xf32, #tpu.memory_space<vmem>>, %arg8: memref<1x32xf32, #tpu.memory_space<vmem>>, %arg9: memref<32x64xbf16, #tpu.memory_space<vmem>>, %arg10: memref<1x64xf32, #tpu.memory_space<vmem>>, %arg11: memref<32x64xbf16, #tpu.memory_space<vmem>>, %arg12: memref<1x64xf32, #tpu.memory_space<vmem>>, %arg13: memref<32x32xbf16, #tpu.memory_space<vmem>>, %arg14: memref<1x32xf32, #tpu.memory_space<vmem>>, %arg15: memref<32x32xbf16, #tpu.memory_space<vmem>>, %arg16: memref<1x32xf32, #tpu.memory_space<vmem>>, %arg17: memref<1x32xf32, #tpu.memory_space<vmem>>, %arg18: memref<1x32xf32, #tpu.memory_space<vmem>>, %arg19: memref<1x16x32xf32, #tpu.memory_space<vmem>>, %arg20: memref<1x16x32xf32, #tpu.memory_space<vmem>>, %arg21: memref<16x32xf32, #tpu.memory_space<vmem>>, %arg22: memref<16x32xbf16, #tpu.memory_space<vmem>>, %arg23: memref<16x32xbf16, #tpu.memory_space<vmem>>, %arg24: memref<16x4xf32, #tpu.memory_space<vmem>>, %arg25: memref<16x4xf32, #tpu.memory_space<vmem>>, %arg26: memref<16x32xf32, #tpu.memory_space<vmem>>, %arg27: memref<16x32xbf16, #tpu.memory_space<vmem>>) attributes {dimension_semantics = [#tpu.dimension_semantics<parallel>, #tpu.dimension_semantics<arbitrary>], iteration_bounds = array<i64: 2, 4>, scalar_prefetch = 0 : i64, scratch_operands = 7 : i64, tpu.core_type = #tpu.core_type<tc>, window_params = [{transform_indices = @transform_0, window_bounds = array<i64: 1, 16, 32>}, {transform_indices = @transform_1, window_bounds = array<i64: 1, 16, 32>}, {transform_indices = @transform_2, window_bounds = array<i64: 1, 1, 16>}, {pipeline_mode = #tpu.pipeline_mode<synchronous>, transform_indices = @transform_3, window_bounds = array<i64: 1, 32>}, {pipeline_mode = #tpu.pipeline_mode<synchronous>, transform_indices = @transform_4, window_bounds = array<i64: 1, 32>}, {pipeline_mode = #tpu.pipeline_mode<synchronous>, transform_indices = @transform_5, window_bounds = array<i64: 1, 32>}, {pipeline_mode = #tpu.pipeline_mode<synchronous>, transform_indices = @transform_6, window_bounds = array<i64: 1, 32>}, {pipeline_mode = #tpu.pipeline_mode<synchronous>, transform_indices = @transform_7, window_bounds = array<i64: 32, 64>}, {pipeline_mode = #tpu.pipeline_mode<synchronous>, transform_indices = @transform_8, window_bounds = array<i64: 1, 64>}, {pipeline_mode = #tpu.pipeline_mode<synchronous>, transform_indices = @transform_9, window_bounds = array<i64: 32, 64>}, {pipeline_mode = #tpu.pipeline_mode<synchronous>, transform_indices = @transform_10, window_bounds = array<i64: 1, 64>}, {pipeline_mode = #tpu.pipeline_mode<synchronous>, transform_indices = @transform_11, window_bounds = array<i64: 32, 32>}, {pipeline_mode = #tpu.pipeline_mode<synchronous>, transform_indices = @transform_12, window_bounds = array<i64: 1, 32>}, {pipeline_mode = #tpu.pipeline_mode<synchronous>, transform_indices = @transform_13, window_bounds = array<i64: 32, 32>}, {pipeline_mode = #tpu.pipeline_mode<synchronous>, transform_indices = @transform_14, window_bounds = array<i64: 1, 32>}, {pipeline_mode = #tpu.pipeline_mode<synchronous>, transform_indices = @transform_15, window_bounds = array<i64: 1, 32>}, {pipeline_mode = #tpu.pipeline_mode<synchronous>, transform_indices = @transform_16, window_bounds = array<i64: 1, 32>}, {transform_indices = @transform_17, window_bounds = array<i64: 1, 16, 32>}, {transform_indices = @transform_18, window_bounds = array<i64: 1, 16, 32>}]} {
    %c0_i32 = arith.constant 0 : i32
    %0 = arith.cmpi eq, %arg1, %c0_i32 : i32
    %1 = arith.extui %0 : i1 to i32
    %c0_i32_0 = arith.constant 0 : i32
    %2 = arith.cmpi ne, %1, %c0_i32_0 : i32
    scf.if %2 {
      %c0_98 = arith.constant 0 : index
      %c0_99 = arith.constant 0 : index
      %c0_100 = arith.constant 0 : index
      %268 = vector.load %arg3[%c0_98, %c0_99, %c0_100] : memref<1x16x32xf32, #tpu.memory_space<vmem>>, vector<1x16x32xf32>
      %269 = vector.shape_cast %268 : vector<1x16x32xf32> to vector<16x32xf32>
      %c0_101 = arith.constant 0 : index
      %c0_102 = arith.constant 0 : index
      %270 = vector.load %arg7[%c0_101, %c0_102] : memref<1x32xf32, #tpu.memory_space<vmem>>, vector<1x32xf32>
      %c0_103 = arith.constant 0 : index
      %c0_104 = arith.constant 0 : index
      %271 = vector.load %arg8[%c0_103, %c0_104] : memref<1x32xf32, #tpu.memory_space<vmem>>, vector<1x32xf32>
      %cst_105 = arith.constant dense<0.000000e+00> : vector<16xf32>
      %272 = vector.multi_reduction <add>, %269, %cst_105 [1] : vector<16x32xf32> to vector<16xf32>
      %273 = vector.shape_cast %272 : vector<16xf32> to vector<16x1xf32>
      %cst_106 = arith.constant 3.200000e+01 : f32
      %274 = vector.broadcast %cst_106 : f32 to vector<16x1xf32>
      %275 = arith.divf %273, %274 : vector<16x1xf32>
      %276 = vector.broadcast %275 : vector<16x1xf32> to vector<16x32xf32>
      %277 = arith.subf %269, %276 : vector<16x32xf32>
      %278 = arith.mulf %277, %277 : vector<16x32xf32>
      %cst_107 = arith.constant dense<0.000000e+00> : vector<16xf32>
      %279 = vector.multi_reduction <add>, %278, %cst_107 [1] : vector<16x32xf32> to vector<16xf32>
      %280 = vector.shape_cast %279 : vector<16xf32> to vector<16x1xf32>
      %cst_108 = arith.constant 3.200000e+01 : f32
      %281 = vector.broadcast %cst_108 : f32 to vector<16x1xf32>
      %282 = arith.divf %280, %281 : vector<16x1xf32>
      %283 = vector.broadcast %275 : vector<16x1xf32> to vector<16x32xf32>
      %284 = arith.subf %269, %283 : vector<16x32xf32>
      %cst_109 = arith.constant 9.99999974E-6 : f32
      %285 = vector.broadcast %cst_109 : f32 to vector<16x1xf32>
      %286 = arith.addf %282, %285 : vector<16x1xf32>
      %287 = math.rsqrt %286 : vector<16x1xf32>
      %288 = vector.broadcast %287 : vector<16x1xf32> to vector<16x32xf32>
      %289 = arith.mulf %284, %288 : vector<16x32xf32>
      %290 = vector.broadcast %270 : vector<1x32xf32> to vector<16x32xf32>
      %291 = arith.mulf %289, %290 : vector<16x32xf32>
      %292 = vector.broadcast %271 : vector<1x32xf32> to vector<16x32xf32>
      %293 = arith.addf %291, %292 : vector<16x32xf32>
      %c0_110 = arith.constant 0 : index
      %c0_111 = arith.constant 0 : index
      %294 = vector.load %arg21[%c0_110, %c0_111] : memref<16x32xf32, #tpu.memory_space<vmem>>, vector<16x32xf32>
      tpu.vector_store %arg21[%c0_110, %c0_111], %293 {strides = array<i32>} : memref<16x32xf32, #tpu.memory_space<vmem>>, vector<16x32xf32>,
      %295 = arith.truncf %293 : vector<16x32xf32> to vector<16x32xbf16>
      %c0_112 = arith.constant 0 : index
      %c0_113 = arith.constant 0 : index
      %296 = vector.load %arg11[%c0_112, %c0_113] : memref<32x64xbf16, #tpu.memory_space<vmem>>, vector<32x64xbf16>
      %cst_114 = arith.constant dense<0.000000e+00> : vector<16x64xf32>
      %297 = tpu.matmul %295, %296, %cst_114 {dimension_numbers = #tpu.dot_dimension_numbers<[1], [0], [0], [1], [0, 0, 1, 1], [], []>} : vector<16x32xbf16>, vector<32x64xbf16>, vector<16x64xf32> -> vector<16x64xf32>
      %c0_115 = arith.constant 0 : index
      %c0_116 = arith.constant 0 : index
      %298 = vector.load %arg12[%c0_115, %c0_116] : memref<1x64xf32, #tpu.memory_space<vmem>>, vector<1x64xf32>
      %299 = vector.broadcast %298 : vector<1x64xf32> to vector<16x64xf32>
      %300 = arith.addf %297, %299 : vector<16x64xf32>
      %301 = vector.extract_strided_slice %300 {offsets = [0, 0], sizes = [16, 32], strides = [1, 1]} : vector<16x64xf32> to vector<16x32xf32>
      %302 = arith.truncf %301 : vector<16x32xf32> to vector<16x32xbf16>
      %c0_117 = arith.constant 0 : index
      %c0_118 = arith.constant 0 : index
      %303 = vector.load %arg22[%c0_117, %c0_118] : memref<16x32xbf16, #tpu.memory_space<vmem>>, vector<16x32xbf16>
      tpu.vector_store %arg22[%c0_117, %c0_118], %302 {strides = array<i32>} : memref<16x32xbf16, #tpu.memory_space<vmem>>, vector<16x32xbf16>,
      %304 = vector.extract_strided_slice %300 {offsets = [0, 32], sizes = [16, 32], strides = [1, 1]} : vector<16x64xf32> to vector<16x32xf32>
      %305 = arith.truncf %304 : vector<16x32xf32> to vector<16x32xbf16>
      %c0_119 = arith.constant 0 : index
      %c0_120 = arith.constant 0 : index
      %306 = vector.load %arg23[%c0_119, %c0_120] : memref<16x32xbf16, #tpu.memory_space<vmem>>, vector<16x32xbf16>
      tpu.vector_store %arg23[%c0_119, %c0_120], %305 {strides = array<i32>} : memref<16x32xbf16, #tpu.memory_space<vmem>>, vector<16x32xbf16>,
      %cst_121 = arith.constant 0xFF800000 : f32
      %307 = vector.broadcast %cst_121 : f32 to vector<16x4xf32>
      %c0_122 = arith.constant 0 : index
      %c0_123 = arith.constant 0 : index
      %308 = vector.load %arg24[%c0_122, %c0_123] : memref<16x4xf32, #tpu.memory_space<vmem>>, vector<16x4xf32>
      tpu.vector_store %arg24[%c0_122, %c0_123], %307 {strides = array<i32>} : memref<16x4xf32, #tpu.memory_space<vmem>>, vector<16x4xf32>,
      %cst_124 = arith.constant 0.000000e+00 : f32
      %309 = vector.broadcast %cst_124 : f32 to vector<16x4xf32>
      %c0_125 = arith.constant 0 : index
      %c0_126 = arith.constant 0 : index
      %310 = vector.load %arg25[%c0_125, %c0_126] : memref<16x4xf32, #tpu.memory_space<vmem>>, vector<16x4xf32>
      tpu.vector_store %arg25[%c0_125, %c0_126], %309 {strides = array<i32>} : memref<16x4xf32, #tpu.memory_space<vmem>>, vector<16x4xf32>,
      %cst_127 = arith.constant 0.000000e+00 : f32
      %311 = vector.broadcast %cst_127 : f32 to vector<16x32xf32>
      %c0_128 = arith.constant 0 : index
      %c0_129 = arith.constant 0 : index
      %312 = vector.load %arg26[%c0_128, %c0_129] : memref<16x32xf32, #tpu.memory_space<vmem>>, vector<16x32xf32>
      tpu.vector_store %arg26[%c0_128, %c0_129], %311 {strides = array<i32>} : memref<16x32xf32, #tpu.memory_space<vmem>>, vector<16x32xf32>,
    } else {
    }
    %c0 = arith.constant 0 : index
    %c0_1 = arith.constant 0 : index
    %c0_2 = arith.constant 0 : index
    %3 = vector.load %arg2[%c0, %c0_1, %c0_2] : memref<1x16x32xf32, #tpu.memory_space<vmem>>, vector<1x16x32xf32>
    %4 = vector.shape_cast %3 : vector<1x16x32xf32> to vector<16x32xf32>
    %c0_3 = arith.constant 0 : index
    %c0_4 = arith.constant 0 : index
    %5 = vector.load %arg5[%c0_3, %c0_4] : memref<1x32xf32, #tpu.memory_space<vmem>>, vector<1x32xf32>
    %c0_5 = arith.constant 0 : index
    %c0_6 = arith.constant 0 : index
    %6 = vector.load %arg6[%c0_5, %c0_6] : memref<1x32xf32, #tpu.memory_space<vmem>>, vector<1x32xf32>
    %cst = arith.constant dense<0.000000e+00> : vector<16xf32>
    %7 = vector.multi_reduction <add>, %4, %cst [1] : vector<16x32xf32> to vector<16xf32>
    %8 = vector.shape_cast %7 : vector<16xf32> to vector<16x1xf32>
    %cst_7 = arith.constant 3.200000e+01 : f32
    %9 = vector.broadcast %cst_7 : f32 to vector<16x1xf32>
    %10 = arith.divf %8, %9 : vector<16x1xf32>
    %11 = vector.broadcast %10 : vector<16x1xf32> to vector<16x32xf32>
    %12 = arith.subf %4, %11 : vector<16x32xf32>
    %13 = arith.mulf %12, %12 : vector<16x32xf32>
    %cst_8 = arith.constant dense<0.000000e+00> : vector<16xf32>
    %14 = vector.multi_reduction <add>, %13, %cst_8 [1] : vector<16x32xf32> to vector<16xf32>
    %15 = vector.shape_cast %14 : vector<16xf32> to vector<16x1xf32>
    %cst_9 = arith.constant 3.200000e+01 : f32
    %16 = vector.broadcast %cst_9 : f32 to vector<16x1xf32>
    %17 = arith.divf %15, %16 : vector<16x1xf32>
    %18 = vector.broadcast %10 : vector<16x1xf32> to vector<16x32xf32>
    %19 = arith.subf %4, %18 : vector<16x32xf32>
    %cst_10 = arith.constant 9.99999974E-6 : f32
    %20 = vector.broadcast %cst_10 : f32 to vector<16x1xf32>
    %21 = arith.addf %17, %20 : vector<16x1xf32>
    %22 = math.rsqrt %21 : vector<16x1xf32>
    %23 = vector.broadcast %22 : vector<16x1xf32> to vector<16x32xf32>
    %24 = arith.mulf %19, %23 : vector<16x32xf32>
    %25 = vector.broadcast %5 : vector<1x32xf32> to vector<16x32xf32>
    %26 = arith.mulf %24, %25 : vector<16x32xf32>
    %27 = vector.broadcast %6 : vector<1x32xf32> to vector<16x32xf32>
    %28 = arith.addf %26, %27 : vector<16x32xf32>
    %29 = arith.truncf %28 : vector<16x32xf32> to vector<16x32xbf16>
    %c0_11 = arith.constant 0 : index
    %c0_12 = arith.constant 0 : index
    %30 = vector.load %arg9[%c0_11, %c0_12] : memref<32x64xbf16, #tpu.memory_space<vmem>>, vector<32x64xbf16>
    %cst_13 = arith.constant dense<0.000000e+00> : vector<16x64xf32>
    %31 = tpu.matmul %29, %30, %cst_13 {dimension_numbers = #tpu.dot_dimension_numbers<[1], [0], [0], [1], [0, 0, 1, 1], [], []>} : vector<16x32xbf16>, vector<32x64xbf16>, vector<16x64xf32> -> vector<16x64xf32>
    %c0_14 = arith.constant 0 : index
    %c0_15 = arith.constant 0 : index
    %32 = vector.load %arg10[%c0_14, %c0_15] : memref<1x64xf32, #tpu.memory_space<vmem>>, vector<1x64xf32>
    %33 = vector.broadcast %32 : vector<1x64xf32> to vector<16x64xf32>
    %34 = arith.addf %31, %33 : vector<16x64xf32>
    %35 = vector.extract_strided_slice %34 {offsets = [0, 0], sizes = [16, 32], strides = [1, 1]} : vector<16x64xf32> to vector<16x32xf32>
    %36 = arith.truncf %35 : vector<16x32xf32> to vector<16x32xbf16>
    %37 = vector.extract_strided_slice %34 {offsets = [0, 32], sizes = [16, 32], strides = [1, 1]} : vector<16x64xf32> to vector<16x32xf32>
    %38 = arith.truncf %37 : vector<16x32xf32> to vector<16x32xbf16>
    %c0_16 = arith.constant 0 : index
    %c0_17 = arith.constant 0 : index
    %39 = vector.load %arg22[%c0_16, %c0_17] : memref<16x32xbf16, #tpu.memory_space<vmem>>, vector<16x32xbf16>
    %c0_18 = arith.constant 0 : index
    %c0_19 = arith.constant 0 : index
    %40 = vector.load %arg23[%c0_18, %c0_19] : memref<16x32xbf16, #tpu.memory_space<vmem>>, vector<16x32xbf16>
    %c0_20 = arith.constant 0 : index
    %c0_21 = arith.constant 0 : index
    %c0_22 = arith.constant 0 : index
    %41 = vector.load %arg4[%c0_20, %c0_21, %c0_22] : memref<1x1x16xf32, #tpu.memory_space<vmem>>, vector<1x1x16xf32>
    %42 = vector.shape_cast %41 : vector<1x1x16xf32> to vector<1x16xf32>
    %c0_23 = arith.constant 0 : index
    %c0_24 = arith.constant 0 : index
    %43 = vector.load %arg24[%c0_23, %c0_24] : memref<16x4xf32, #tpu.memory_space<vmem>>, vector<16x4xf32>
    %c0_25 = arith.constant 0 : index
    %c0_26 = arith.constant 0 : index
    %44 = vector.load %arg25[%c0_25, %c0_26] : memref<16x4xf32, #tpu.memory_space<vmem>>, vector<16x4xf32>
    %c0_27 = arith.constant 0 : index
    %c0_28 = arith.constant 0 : index
    %45 = vector.load %arg26[%c0_27, %c0_28] : memref<16x32xf32, #tpu.memory_space<vmem>>, vector<16x32xf32>
    %46 = vector.extract_strided_slice %36 {offsets = [0, 0], sizes = [16, 8], strides = [1, 1]} : vector<16x32xbf16> to vector<16x8xbf16>
    %47 = vector.extract_strided_slice %39 {offsets = [0, 0], sizes = [16, 8], strides = [1, 1]} : vector<16x32xbf16> to vector<16x8xbf16>
    %48 = vector.extract_strided_slice %38 {offsets = [0, 0], sizes = [16, 8], strides = [1, 1]} : vector<16x32xbf16> to vector<16x8xbf16>
    %49 = vector.extract_strided_slice %40 {offsets = [0, 0], sizes = [16, 8], strides = [1, 1]} : vector<16x32xbf16> to vector<16x8xbf16>
    %cst_29 = arith.constant dense<0.000000e+00> : vector<16x16xf32>
    %50 = tpu.matmul %46, %47, %cst_29 {dimension_numbers = #tpu.dot_dimension_numbers<[1], [1], [0], [0], [0, 0, 1, 0], [], []>} : vector<16x8xbf16>, vector<16x8xbf16>, vector<16x16xf32> -> vector<16x16xf32>
    %cst_30 = arith.constant -5.000000e+04 : f32
    %cst_31 = arith.constant 5.000000e+04 : f32
    %51 = vector.broadcast %cst_30 : f32 to vector<16x16xf32>
    %52 = arith.maximumf %51, %50 : vector<16x16xf32>
    %53 = vector.broadcast %cst_31 : f32 to vector<16x16xf32>
    %54 = arith.minimumf %53, %52 : vector<16x16xf32>
    %55 = vector.broadcast %42 : vector<1x16xf32> to vector<16x16xf32>
    %56 = arith.addf %54, %55 : vector<16x16xf32>
    %cst_32 = arith.constant dense<0xFF800000> : vector<16xf32>
    %57 = vector.multi_reduction <maximumf>, %56, %cst_32 [1] : vector<16x16xf32> to vector<16xf32>
    %58 = vector.shape_cast %57 : vector<16xf32> to vector<16x1xf32>
    %59 = vector.broadcast %58 : vector<16x1xf32> to vector<16x16xf32>
    %60 = arith.subf %56, %59 : vector<16x16xf32>
    %61 = math.exp %60 : vector<16x16xf32>
    %cst_33 = arith.constant dense<0.000000e+00> : vector<16xf32>
    %62 = vector.multi_reduction <add>, %61, %cst_33 [1] : vector<16x16xf32> to vector<16xf32>
    %63 = vector.shape_cast %62 : vector<16xf32> to vector<16x1xf32>
    %64 = arith.truncf %61 : vector<16x16xf32> to vector<16x16xbf16>
    %cst_34 = arith.constant dense<0.000000e+00> : vector<16x8xf32>
    %65 = tpu.matmul %64, %49, %cst_34 {dimension_numbers = #tpu.dot_dimension_numbers<[1], [0], [0], [1], [0, 0, 1, 1], [], []>} : vector<16x16xbf16>, vector<16x8xbf16>, vector<16x8xf32> -> vector<16x8xf32>
    %cst_35 = arith.constant 1.000000e+00 : f32
    %66 = vector.broadcast %cst_35 : f32 to vector<16x1xf32>
    %67 = arith.divf %66, %63 : vector<16x1xf32>
    %68 = vector.broadcast %67 : vector<16x1xf32> to vector<16x8xf32>
    %69 = arith.mulf %65, %68 : vector<16x8xf32>
    %70 = arith.truncf %69 : vector<16x8xf32> to vector<16x8xbf16>
    %cst_36 = arith.constant dense<0.000000e+00> : vector<16x16xf32>
    %71 = tpu.matmul %47, %46, %cst_36 {dimension_numbers = #tpu.dot_dimension_numbers<[1], [1], [0], [0], [0, 0, 1, 0], [], []>} : vector<16x8xbf16>, vector<16x8xbf16>, vector<16x16xf32> -> vector<16x16xf32>
    %cst_37 = arith.constant -5.000000e+04 : f32
    %cst_38 = arith.constant 5.000000e+04 : f32
    %72 = vector.broadcast %cst_37 : f32 to vector<16x16xf32>
    %73 = arith.maximumf %72, %71 : vector<16x16xf32>
    %74 = vector.broadcast %cst_38 : f32 to vector<16x16xf32>
    %75 = arith.minimumf %74, %73 : vector<16x16xf32>
    %76 = vector.extract_strided_slice %43 {offsets = [0, 0], sizes = [16, 1], strides = [1, 1]} : vector<16x4xf32> to vector<16x1xf32>
    %cst_39 = arith.constant dense<0xFF800000> : vector<16xf32>
    %77 = vector.multi_reduction <maximumf>, %75, %cst_39 [1] : vector<16x16xf32> to vector<16xf32>
    %78 = vector.shape_cast %77 : vector<16xf32> to vector<16x1xf32>
    %79 = arith.maximumf %76, %78 : vector<16x1xf32>
    %80 = arith.subf %76, %79 : vector<16x1xf32>
    %81 = math.exp %80 : vector<16x1xf32>
    %82 = vector.broadcast %79 : vector<16x1xf32> to vector<16x16xf32>
    %83 = arith.subf %75, %82 : vector<16x16xf32>
    %84 = math.exp %83 : vector<16x16xf32>
    %85 = vector.extract_strided_slice %44 {offsets = [0, 0], sizes = [16, 1], strides = [1, 1]} : vector<16x4xf32> to vector<16x1xf32>
    %86 = arith.mulf %81, %85 : vector<16x1xf32>
    %cst_40 = arith.constant dense<0.000000e+00> : vector<16xf32>
    %87 = vector.multi_reduction <add>, %84, %cst_40 [1] : vector<16x16xf32> to vector<16xf32>
    %88 = vector.shape_cast %87 : vector<16xf32> to vector<16x1xf32>
    %89 = arith.addf %86, %88 : vector<16x1xf32>
    %90 = vector.extract_strided_slice %45 {offsets = [0, 0], sizes = [16, 8], strides = [1, 1]} : vector<16x32xf32> to vector<16x8xf32>
    %91 = vector.broadcast %81 : vector<16x1xf32> to vector<16x8xf32>
    %92 = arith.mulf %91, %90 : vector<16x8xf32>
    %93 = arith.truncf %84 : vector<16x16xf32> to vector<16x16xbf16>
    %cst_41 = arith.constant dense<0.000000e+00> : vector<16x8xf32>
    %94 = tpu.matmul %93, %48, %cst_41 {dimension_numbers = #tpu.dot_dimension_numbers<[1], [0], [0], [1], [0, 0, 1, 1], [], []>} : vector<16x16xbf16>, vector<16x8xbf16>, vector<16x8xf32> -> vector<16x8xf32>
    %95 = arith.addf %92, %94 : vector<16x8xf32>
    %96 = vector.extract_strided_slice %36 {offsets = [0, 8], sizes = [16, 8], strides = [1, 1]} : vector<16x32xbf16> to vector<16x8xbf16>
    %97 = vector.extract_strided_slice %39 {offsets = [0, 8], sizes = [16, 8], strides = [1, 1]} : vector<16x32xbf16> to vector<16x8xbf16>
    %98 = vector.extract_strided_slice %38 {offsets = [0, 8], sizes = [16, 8], strides = [1, 1]} : vector<16x32xbf16> to vector<16x8xbf16>
    %99 = vector.extract_strided_slice %40 {offsets = [0, 8], sizes = [16, 8], strides = [1, 1]} : vector<16x32xbf16> to vector<16x8xbf16>
    %cst_42 = arith.constant dense<0.000000e+00> : vector<16x16xf32>
    %100 = tpu.matmul %96, %97, %cst_42 {dimension_numbers = #tpu.dot_dimension_numbers<[1], [1], [0], [0], [0, 0, 1, 0], [], []>} : vector<16x8xbf16>, vector<16x8xbf16>, vector<16x16xf32> -> vector<16x16xf32>
    %cst_43 = arith.constant -5.000000e+04 : f32
    %cst_44 = arith.constant 5.000000e+04 : f32
    %101 = vector.broadcast %cst_43 : f32 to vector<16x16xf32>
    %102 = arith.maximumf %101, %100 : vector<16x16xf32>
    %103 = vector.broadcast %cst_44 : f32 to vector<16x16xf32>
    %104 = arith.minimumf %103, %102 : vector<16x16xf32>
    %105 = vector.broadcast %42 : vector<1x16xf32> to vector<16x16xf32>
    %106 = arith.addf %104, %105 : vector<16x16xf32>
    %cst_45 = arith.constant dense<0xFF800000> : vector<16xf32>
    %107 = vector.multi_reduction <maximumf>, %106, %cst_45 [1] : vector<16x16xf32> to vector<16xf32>
    %108 = vector.shape_cast %107 : vector<16xf32> to vector<16x1xf32>
    %109 = vector.broadcast %108 : vector<16x1xf32> to vector<16x16xf32>
    %110 = arith.subf %106, %109 : vector<16x16xf32>
    %111 = math.exp %110 : vector<16x16xf32>
    %cst_46 = arith.constant dense<0.000000e+00> : vector<16xf32>
    %112 = vector.multi_reduction <add>, %111, %cst_46 [1] : vector<16x16xf32> to vector<16xf32>
    %113 = vector.shape_cast %112 : vector<16xf32> to vector<16x1xf32>
    %114 = arith.truncf %111 : vector<16x16xf32> to vector<16x16xbf16>
    %cst_47 = arith.constant dense<0.000000e+00> : vector<16x8xf32>
    %115 = tpu.matmul %114, %99, %cst_47 {dimension_numbers = #tpu.dot_dimension_numbers<[1], [0], [0], [1], [0, 0, 1, 1], [], []>} : vector<16x16xbf16>, vector<16x8xbf16>, vector<16x8xf32> -> vector<16x8xf32>
    %cst_48 = arith.constant 1.000000e+00 : f32
    %116 = vector.broadcast %cst_48 : f32 to vector<16x1xf32>
    %117 = arith.divf %116, %113 : vector<16x1xf32>
    %118 = vector.broadcast %117 : vector<16x1xf32> to vector<16x8xf32>
    %119 = arith.mulf %115, %118 : vector<16x8xf32>
    %120 = arith.truncf %119 : vector<16x8xf32> to vector<16x8xbf16>
    %cst_49 = arith.constant dense<0.000000e+00> : vector<16x16xf32>
    %121 = tpu.matmul %97, %96, %cst_49 {dimension_numbers = #tpu.dot_dimension_numbers<[1], [1], [0], [0], [0, 0, 1, 0], [], []>} : vector<16x8xbf16>, vector<16x8xbf16>, vector<16x16xf32> -> vector<16x16xf32>
    %cst_50 = arith.constant -5.000000e+04 : f32
    %cst_51 = arith.constant 5.000000e+04 : f32
    %122 = vector.broadcast %cst_50 : f32 to vector<16x16xf32>
    %123 = arith.maximumf %122, %121 : vector<16x16xf32>
    %124 = vector.broadcast %cst_51 : f32 to vector<16x16xf32>
    %125 = arith.minimumf %124, %123 : vector<16x16xf32>
    %126 = vector.extract_strided_slice %43 {offsets = [0, 1], sizes = [16, 1], strides = [1, 1]} : vector<16x4xf32> to vector<16x1xf32>
    %cst_52 = arith.constant dense<0xFF800000> : vector<16xf32>
    %127 = vector.multi_reduction <maximumf>, %125, %cst_52 [1] : vector<16x16xf32> to vector<16xf32>
    %128 = vector.shape_cast %127 : vector<16xf32> to vector<16x1xf32>
    %129 = arith.maximumf %126, %128 : vector<16x1xf32>
    %130 = arith.subf %126, %129 : vector<16x1xf32>
    %131 = math.exp %130 : vector<16x1xf32>
    %132 = vector.broadcast %129 : vector<16x1xf32> to vector<16x16xf32>
    %133 = arith.subf %125, %132 : vector<16x16xf32>
    %134 = math.exp %133 : vector<16x16xf32>
    %135 = vector.extract_strided_slice %44 {offsets = [0, 1], sizes = [16, 1], strides = [1, 1]} : vector<16x4xf32> to vector<16x1xf32>
    %136 = arith.mulf %131, %135 : vector<16x1xf32>
    %cst_53 = arith.constant dense<0.000000e+00> : vector<16xf32>
    %137 = vector.multi_reduction <add>, %134, %cst_53 [1] : vector<16x16xf32> to vector<16xf32>
    %138 = vector.shape_cast %137 : vector<16xf32> to vector<16x1xf32>
    %139 = arith.addf %136, %138 : vector<16x1xf32>
    %140 = vector.extract_strided_slice %45 {offsets = [0, 8], sizes = [16, 8], strides = [1, 1]} : vector<16x32xf32> to vector<16x8xf32>
    %141 = vector.broadcast %131 : vector<16x1xf32> to vector<16x8xf32>
    %142 = arith.mulf %141, %140 : vector<16x8xf32>
    %143 = arith.truncf %134 : vector<16x16xf32> to vector<16x16xbf16>
    %cst_54 = arith.constant dense<0.000000e+00> : vector<16x8xf32>
    %144 = tpu.matmul %143, %98, %cst_54 {dimension_numbers = #tpu.dot_dimension_numbers<[1], [0], [0], [1], [0, 0, 1, 1], [], []>} : vector<16x16xbf16>, vector<16x8xbf16>, vector<16x8xf32> -> vector<16x8xf32>
    %145 = arith.addf %142, %144 : vector<16x8xf32>
    %146 = vector.extract_strided_slice %36 {offsets = [0, 16], sizes = [16, 8], strides = [1, 1]} : vector<16x32xbf16> to vector<16x8xbf16>
    %147 = vector.extract_strided_slice %39 {offsets = [0, 16], sizes = [16, 8], strides = [1, 1]} : vector<16x32xbf16> to vector<16x8xbf16>
    %148 = vector.extract_strided_slice %38 {offsets = [0, 16], sizes = [16, 8], strides = [1, 1]} : vector<16x32xbf16> to vector<16x8xbf16>
    %149 = vector.extract_strided_slice %40 {offsets = [0, 16], sizes = [16, 8], strides = [1, 1]} : vector<16x32xbf16> to vector<16x8xbf16>
    %cst_55 = arith.constant dense<0.000000e+00> : vector<16x16xf32>
    %150 = tpu.matmul %146, %147, %cst_55 {dimension_numbers = #tpu.dot_dimension_numbers<[1], [1], [0], [0], [0, 0, 1, 0], [], []>} : vector<16x8xbf16>, vector<16x8xbf16>, vector<16x16xf32> -> vector<16x16xf32>
    %cst_56 = arith.constant -5.000000e+04 : f32
    %cst_57 = arith.constant 5.000000e+04 : f32
    %151 = vector.broadcast %cst_56 : f32 to vector<16x16xf32>
    %152 = arith.maximumf %151, %150 : vector<16x16xf32>
    %153 = vector.broadcast %cst_57 : f32 to vector<16x16xf32>
    %154 = arith.minimumf %153, %152 : vector<16x16xf32>
    %155 = vector.broadcast %42 : vector<1x16xf32> to vector<16x16xf32>
    %156 = arith.addf %154, %155 : vector<16x16xf32>
    %cst_58 = arith.constant dense<0xFF800000> : vector<16xf32>
    %157 = vector.multi_reduction <maximumf>, %156, %cst_58 [1] : vector<16x16xf32> to vector<16xf32>
    %158 = vector.shape_cast %157 : vector<16xf32> to vector<16x1xf32>
    %159 = vector.broadcast %158 : vector<16x1xf32> to vector<16x16xf32>
    %160 = arith.subf %156, %159 : vector<16x16xf32>
    %161 = math.exp %160 : vector<16x16xf32>
    %cst_59 = arith.constant dense<0.000000e+00> : vector<16xf32>
    %162 = vector.multi_reduction <add>, %161, %cst_59 [1] : vector<16x16xf32> to vector<16xf32>
    %163 = vector.shape_cast %162 : vector<16xf32> to vector<16x1xf32>
    %164 = arith.truncf %161 : vector<16x16xf32> to vector<16x16xbf16>
    %cst_60 = arith.constant dense<0.000000e+00> : vector<16x8xf32>
    %165 = tpu.matmul %164, %149, %cst_60 {dimension_numbers = #tpu.dot_dimension_numbers<[1], [0], [0], [1], [0, 0, 1, 1], [], []>} : vector<16x16xbf16>, vector<16x8xbf16>, vector<16x8xf32> -> vector<16x8xf32>
    %cst_61 = arith.constant 1.000000e+00 : f32
    %166 = vector.broadcast %cst_61 : f32 to vector<16x1xf32>
    %167 = arith.divf %166, %163 : vector<16x1xf32>
    %168 = vector.broadcast %167 : vector<16x1xf32> to vector<16x8xf32>
    %169 = arith.mulf %165, %168 : vector<16x8xf32>
    %170 = arith.truncf %169 : vector<16x8xf32> to vector<16x8xbf16>
    %cst_62 = arith.constant dense<0.000000e+00> : vector<16x16xf32>
    %171 = tpu.matmul %147, %146, %cst_62 {dimension_numbers = #tpu.dot_dimension_numbers<[1], [1], [0], [0], [0, 0, 1, 0], [], []>} : vector<16x8xbf16>, vector<16x8xbf16>, vector<16x16xf32> -> vector<16x16xf32>
    %cst_63 = arith.constant -5.000000e+04 : f32
    %cst_64 = arith.constant 5.000000e+04 : f32
    %172 = vector.broadcast %cst_63 : f32 to vector<16x16xf32>
    %173 = arith.maximumf %172, %171 : vector<16x16xf32>
    %174 = vector.broadcast %cst_64 : f32 to vector<16x16xf32>
    %175 = arith.minimumf %174, %173 : vector<16x16xf32>
    %176 = vector.extract_strided_slice %43 {offsets = [0, 2], sizes = [16, 1], strides = [1, 1]} : vector<16x4xf32> to vector<16x1xf32>
    %cst_65 = arith.constant dense<0xFF800000> : vector<16xf32>
    %177 = vector.multi_reduction <maximumf>, %175, %cst_65 [1] : vector<16x16xf32> to vector<16xf32>
    %178 = vector.shape_cast %177 : vector<16xf32> to vector<16x1xf32>
    %179 = arith.maximumf %176, %178 : vector<16x1xf32>
    %180 = arith.subf %176, %179 : vector<16x1xf32>
    %181 = math.exp %180 : vector<16x1xf32>
    %182 = vector.broadcast %179 : vector<16x1xf32> to vector<16x16xf32>
    %183 = arith.subf %175, %182 : vector<16x16xf32>
    %184 = math.exp %183 : vector<16x16xf32>
    %185 = vector.extract_strided_slice %44 {offsets = [0, 2], sizes = [16, 1], strides = [1, 1]} : vector<16x4xf32> to vector<16x1xf32>
    %186 = arith.mulf %181, %185 : vector<16x1xf32>
    %cst_66 = arith.constant dense<0.000000e+00> : vector<16xf32>
    %187 = vector.multi_reduction <add>, %184, %cst_66 [1] : vector<16x16xf32> to vector<16xf32>
    %188 = vector.shape_cast %187 : vector<16xf32> to vector<16x1xf32>
    %189 = arith.addf %186, %188 : vector<16x1xf32>
    %190 = vector.extract_strided_slice %45 {offsets = [0, 16], sizes = [16, 8], strides = [1, 1]} : vector<16x32xf32> to vector<16x8xf32>
    %191 = vector.broadcast %181 : vector<16x1xf32> to vector<16x8xf32>
    %192 = arith.mulf %191, %190 : vector<16x8xf32>
    %193 = arith.truncf %184 : vector<16x16xf32> to vector<16x16xbf16>
    %cst_67 = arith.constant dense<0.000000e+00> : vector<16x8xf32>
    %194 = tpu.matmul %193, %148, %cst_67 {dimension_numbers = #tpu.dot_dimension_numbers<[1], [0], [0], [1], [0, 0, 1, 1], [], []>} : vector<16x16xbf16>, vector<16x8xbf16>, vector<16x8xf32> -> vector<16x8xf32>
    %195 = arith.addf %192, %194 : vector<16x8xf32>
    %196 = vector.extract_strided_slice %36 {offsets = [0, 24], sizes = [16, 8], strides = [1, 1]} : vector<16x32xbf16> to vector<16x8xbf16>
    %197 = vector.extract_strided_slice %39 {offsets = [0, 24], sizes = [16, 8], strides = [1, 1]} : vector<16x32xbf16> to vector<16x8xbf16>
    %198 = vector.extract_strided_slice %38 {offsets = [0, 24], sizes = [16, 8], strides = [1, 1]} : vector<16x32xbf16> to vector<16x8xbf16>
    %199 = vector.extract_strided_slice %40 {offsets = [0, 24], sizes = [16, 8], strides = [1, 1]} : vector<16x32xbf16> to vector<16x8xbf16>
    %cst_68 = arith.constant dense<0.000000e+00> : vector<16x16xf32>
    %200 = tpu.matmul %196, %197, %cst_68 {dimension_numbers = #tpu.dot_dimension_numbers<[1], [1], [0], [0], [0, 0, 1, 0], [], []>} : vector<16x8xbf16>, vector<16x8xbf16>, vector<16x16xf32> -> vector<16x16xf32>
    %cst_69 = arith.constant -5.000000e+04 : f32
    %cst_70 = arith.constant 5.000000e+04 : f32
    %201 = vector.broadcast %cst_69 : f32 to vector<16x16xf32>
    %202 = arith.maximumf %201, %200 : vector<16x16xf32>
    %203 = vector.broadcast %cst_70 : f32 to vector<16x16xf32>
    %204 = arith.minimumf %203, %202 : vector<16x16xf32>
    %205 = vector.broadcast %42 : vector<1x16xf32> to vector<16x16xf32>
    %206 = arith.addf %204, %205 : vector<16x16xf32>
    %cst_71 = arith.constant dense<0xFF800000> : vector<16xf32>
    %207 = vector.multi_reduction <maximumf>, %206, %cst_71 [1] : vector<16x16xf32> to vector<16xf32>
    %208 = vector.shape_cast %207 : vector<16xf32> to vector<16x1xf32>
    %209 = vector.broadcast %208 : vector<16x1xf32> to vector<16x16xf32>
    %210 = arith.subf %206, %209 : vector<16x16xf32>
    %211 = math.exp %210 : vector<16x16xf32>
    %cst_72 = arith.constant dense<0.000000e+00> : vector<16xf32>
    %212 = vector.multi_reduction <add>, %211, %cst_72 [1] : vector<16x16xf32> to vector<16xf32>
    %213 = vector.shape_cast %212 : vector<16xf32> to vector<16x1xf32>
    %214 = arith.truncf %211 : vector<16x16xf32> to vector<16x16xbf16>
    %cst_73 = arith.constant dense<0.000000e+00> : vector<16x8xf32>
    %215 = tpu.matmul %214, %199, %cst_73 {dimension_numbers = #tpu.dot_dimension_numbers<[1], [0], [0], [1], [0, 0, 1, 1], [], []>} : vector<16x16xbf16>, vector<16x8xbf16>, vector<16x8xf32> -> vector<16x8xf32>
    %cst_74 = arith.constant 1.000000e+00 : f32
    %216 = vector.broadcast %cst_74 : f32 to vector<16x1xf32>
    %217 = arith.divf %216, %213 : vector<16x1xf32>
    %218 = vector.broadcast %217 : vector<16x1xf32> to vector<16x8xf32>
    %219 = arith.mulf %215, %218 : vector<16x8xf32>
    %220 = arith.truncf %219 : vector<16x8xf32> to vector<16x8xbf16>
    %cst_75 = arith.constant dense<0.000000e+00> : vector<16x16xf32>
    %221 = tpu.matmul %197, %196, %cst_75 {dimension_numbers = #tpu.dot_dimension_numbers<[1], [1], [0], [0], [0, 0, 1, 0], [], []>} : vector<16x8xbf16>, vector<16x8xbf16>, vector<16x16xf32> -> vector<16x16xf32>
    %cst_76 = arith.constant -5.000000e+04 : f32
    %cst_77 = arith.constant 5.000000e+04 : f32
    %222 = vector.broadcast %cst_76 : f32 to vector<16x16xf32>
    %223 = arith.maximumf %222, %221 : vector<16x16xf32>
    %224 = vector.broadcast %cst_77 : f32 to vector<16x16xf32>
    %225 = arith.minimumf %224, %223 : vector<16x16xf32>
    %226 = vector.extract_strided_slice %43 {offsets = [0, 3], sizes = [16, 1], strides = [1, 1]} : vector<16x4xf32> to vector<16x1xf32>
    %cst_78 = arith.constant dense<0xFF800000> : vector<16xf32>
    %227 = vector.multi_reduction <maximumf>, %225, %cst_78 [1] : vector<16x16xf32> to vector<16xf32>
    %228 = vector.shape_cast %227 : vector<16xf32> to vector<16x1xf32>
    %229 = arith.maximumf %226, %228 : vector<16x1xf32>
    %230 = arith.subf %226, %229 : vector<16x1xf32>
    %231 = math.exp %230 : vector<16x1xf32>
    %232 = vector.broadcast %229 : vector<16x1xf32> to vector<16x16xf32>
    %233 = arith.subf %225, %232 : vector<16x16xf32>
    %234 = math.exp %233 : vector<16x16xf32>
    %235 = vector.extract_strided_slice %44 {offsets = [0, 3], sizes = [16, 1], strides = [1, 1]} : vector<16x4xf32> to vector<16x1xf32>
    %236 = arith.mulf %231, %235 : vector<16x1xf32>
    %cst_79 = arith.constant dense<0.000000e+00> : vector<16xf32>
    %237 = vector.multi_reduction <add>, %234, %cst_79 [1] : vector<16x16xf32> to vector<16xf32>
    %238 = vector.shape_cast %237 : vector<16xf32> to vector<16x1xf32>
    %239 = arith.addf %236, %238 : vector<16x1xf32>
    %240 = vector.extract_strided_slice %45 {offsets = [0, 24], sizes = [16, 8], strides = [1, 1]} : vector<16x32xf32> to vector<16x8xf32>
    %241 = vector.broadcast %231 : vector<16x1xf32> to vector<16x8xf32>
    %242 = arith.mulf %241, %240 : vector<16x8xf32>
    %243 = arith.truncf %234 : vector<16x16xf32> to vector<16x16xbf16>
    %cst_80 = arith.constant dense<0.000000e+00> : vector<16x8xf32>
    %244 = tpu.matmul %243, %198, %cst_80 {dimension_numbers = #tpu.dot_dimension_numbers<[1], [0], [0], [1], [0, 0, 1, 1], [], []>} : vector<16x16xbf16>, vector<16x8xbf16>, vector<16x8xf32> -> vector<16x8xf32>
    %245 = arith.addf %242, %244 : vector<16x8xf32>
    %246 = tpu.concatenate %70, %120, %170, %220 in 1 : vector<16x8xbf16>, vector<16x8xbf16>, vector<16x8xbf16>, vector<16x8xbf16> -> vector<16x32xbf16>
    %247 = tpu.concatenate %95, %145, %195, %245 in 1 : vector<16x8xf32>, vector<16x8xf32>, vector<16x8xf32>, vector<16x8xf32> -> vector<16x32xf32>
    %c0_81 = arith.constant 0 : index
    %c0_82 = arith.constant 0 : index
    %248 = vector.load %arg26[%c0_81, %c0_82] : memref<16x32xf32, #tpu.memory_space<vmem>>, vector<16x32xf32>
    tpu.vector_store %arg26[%c0_81, %c0_82], %247 {strides = array<i32>} : memref<16x32xf32, #tpu.memory_space<vmem>>, vector<16x32xf32>,
    %249 = tpu.concatenate %79, %129, %179, %229 in 1 : vector<16x1xf32>, vector<16x1xf32>, vector<16x1xf32>, vector<16x1xf32> -> vector<16x4xf32>
    %c0_83 = arith.constant 0 : index
    %c0_84 = arith.constant 0 : index
    %250 = vector.load %arg24[%c0_83, %c0_84] : memref<16x4xf32, #tpu.memory_space<vmem>>, vector<16x4xf32>
    tpu.vector_store %arg24[%c0_83, %c0_84], %249 {strides = array<i32>} : memref<16x4xf32, #tpu.memory_space<vmem>>, vector<16x4xf32>,
    %251 = tpu.concatenate %89, %139, %189, %239 in 1 : vector<16x1xf32>, vector<16x1xf32>, vector<16x1xf32>, vector<16x1xf32> -> vector<16x4xf32>
    %c0_85 = arith.constant 0 : index
    %c0_86 = arith.constant 0 : index
    %252 = vector.load %arg25[%c0_85, %c0_86] : memref<16x4xf32, #tpu.memory_space<vmem>>, vector<16x4xf32>
    tpu.vector_store %arg25[%c0_85, %c0_86], %251 {strides = array<i32>} : memref<16x4xf32, #tpu.memory_space<vmem>>, vector<16x4xf32>,
    %c0_87 = arith.constant 0 : index
    %c0_88 = arith.constant 0 : index
    %253 = vector.load %arg13[%c0_87, %c0_88] : memref<32x32xbf16, #tpu.memory_space<vmem>>, vector<32x32xbf16>
    %cst_89 = arith.constant dense<0.000000e+00> : vector<16x32xf32>
    %254 = tpu.matmul %246, %253, %cst_89 {dimension_numbers = #tpu.dot_dimension_numbers<[1], [0], [0], [1], [0, 0, 1, 1], [], []>} : vector<16x32xbf16>, vector<32x32xbf16>, vector<16x32xf32> -> vector<16x32xf32>
    %c0_90 = arith.constant 0 : index
    %c0_91 = arith.constant 0 : index
    %255 = vector.load %arg14[%c0_90, %c0_91] : memref<1x32xf32, #tpu.memory_space<vmem>>, vector<1x32xf32>
    %256 = vector.broadcast %255 : vector<1x32xf32> to vector<16x32xf32>
    %257 = arith.addf %254, %256 : vector<16x32xf32>
    %c0_92 = arith.constant 0 : index
    %c0_93 = arith.constant 0 : index
    %258 = vector.load %arg17[%c0_92, %c0_93] : memref<1x32xf32, #tpu.memory_space<vmem>>, vector<1x32xf32>
    %259 = vector.broadcast %258 : vector<1x32xf32> to vector<16x32xf32>
    %260 = arith.mulf %259, %257 : vector<16x32xf32>
    %261 = arith.addf %28, %260 : vector<16x32xf32>
    %c0_94 = arith.constant 0 : index
    %c0_95 = arith.constant 0 : index
    %c0_96 = arith.constant 0 : index
    %262 = vector.load %arg19[%c0_94, %c0_95, %c0_96] : memref<1x16x32xf32, #tpu.memory_space<vmem>>, vector<1x16x32xf32>
    %263 = vector.shape_cast %262 : vector<1x16x32xf32> to vector<16x32xf32>
    %264 = vector.shape_cast %261 : vector<16x32xf32> to vector<1x16x32xf32>
    tpu.vector_store %arg19[%c0_94, %c0_95, %c0_96], %264 {strides = array<i32>} : memref<1x16x32xf32, #tpu.memory_space<vmem>>, vector<1x16x32xf32>,
    %c3_i32 = arith.constant 3 : i32
    %265 = arith.cmpi eq, %arg1, %c3_i32 : i32
    %266 = arith.extui %265 : i1 to i32
    %c0_i32_97 = arith.constant 0 : i32
    %267 = arith.cmpi ne, %266, %c0_i32_97 : i32
    scf.if %267 {
      %c0_98 = arith.constant 0 : index
      %c0_99 = arith.constant 0 : index
      %268 = vector.load %arg25[%c0_98, %c0_99] : memref<16x4xf32, #tpu.memory_space<vmem>>, vector<16x4xf32>
      %cst_100 = arith.constant 1.000000e+00 : f32
      %269 = vector.broadcast %cst_100 : f32 to vector<16x4xf32>
      %270 = arith.divf %269, %268 : vector<16x4xf32>
      %271 = vector.extract_strided_slice %270 {offsets = [0, 0], sizes = [16, 1], strides = [1, 1]} : vector<16x4xf32> to vector<16x1xf32>
      %272 = vector.shape_cast %271 : vector<16x1xf32> to vector<16x1xf32>
      %273 = vector.broadcast %272 : vector<16x1xf32> to vector<16x8xf32>
      %274 = vector.extract_strided_slice %270 {offsets = [0, 1], sizes = [16, 1], strides = [1, 1]} : vector<16x4xf32> to vector<16x1xf32>
      %275 = vector.shape_cast %274 : vector<16x1xf32> to vector<16x1xf32>
      %276 = vector.broadcast %275 : vector<16x1xf32> to vector<16x8xf32>
      %277 = vector.extract_strided_slice %270 {offsets = [0, 2], sizes = [16, 1], strides = [1, 1]} : vector<16x4xf32> to vector<16x1xf32>
      %278 = vector.shape_cast %277 : vector<16x1xf32> to vector<16x1xf32>
      %279 = vector.broadcast %278 : vector<16x1xf32> to vector<16x8xf32>
      %280 = vector.extract_strided_slice %270 {offsets = [0, 3], sizes = [16, 1], strides = [1, 1]} : vector<16x4xf32> to vector<16x1xf32>
      %281 = vector.shape_cast %280 : vector<16x1xf32> to vector<16x1xf32>
      %282 = vector.broadcast %281 : vector<16x1xf32> to vector<16x8xf32>
      %c0_101 = arith.constant 0 : index
      %c0_102 = arith.constant 0 : index
      %283 = vector.load %arg26[%c0_101, %c0_102] : memref<16x32xf32, #tpu.memory_space<vmem>>, vector<16x32xf32>
      %284 = tpu.concatenate %273, %276, %279, %282 in 1 : vector<16x8xf32>, vector<16x8xf32>, vector<16x8xf32>, vector<16x8xf32> -> vector<16x32xf32>
      %285 = arith.mulf %283, %284 : vector<16x32xf32>
      %286 = arith.truncf %285 : vector<16x32xf32> to vector<16x32xbf16>
      %c0_103 = arith.constant 0 : index
      %c0_104 = arith.constant 0 : index
      %287 = vector.load %arg22[%c0_103, %c0_104] : memref<16x32xbf16, #tpu.memory_space<vmem>>, vector<16x32xbf16>
      tpu.vector_store %arg22[%c0_103, %c0_104], %286 {strides = array<i32>} : memref<16x32xbf16, #tpu.memory_space<vmem>>, vector<16x32xbf16>,
      %c0_105 = arith.constant 0 : index
      %c0_106 = arith.constant 0 : index
      %288 = vector.load %arg22[%c0_105, %c0_106] : memref<16x32xbf16, #tpu.memory_space<vmem>>, vector<16x32xbf16>
      %c0_107 = arith.constant 0 : index
      %c0_108 = arith.constant 0 : index
      %289 = vector.load %arg15[%c0_107, %c0_108] : memref<32x32xbf16, #tpu.memory_space<vmem>>, vector<32x32xbf16>
      %cst_109 = arith.constant dense<0.000000e+00> : vector<16x32xf32>
      %290 = tpu.matmul %288, %289, %cst_109 {dimension_numbers = #tpu.dot_dimension_numbers<[1], [0], [0], [1], [0, 0, 1, 1], [], []>} : vector<16x32xbf16>, vector<32x32xbf16>, vector<16x32xf32> -> vector<16x32xf32>
      %c0_110 = arith.constant 0 : index
      %c0_111 = arith.constant 0 : index
      %291 = vector.load %arg16[%c0_110, %c0_111] : memref<1x32xf32, #tpu.memory_space<vmem>>, vector<1x32xf32>
      %292 = vector.broadcast %291 : vector<1x32xf32> to vector<16x32xf32>
      %293 = arith.addf %290, %292 : vector<16x32xf32>
      %c0_112 = arith.constant 0 : index
      %c0_113 = arith.constant 0 : index
      %294 = vector.load %arg21[%c0_112, %c0_113] : memref<16x32xf32, #tpu.memory_space<vmem>>, vector<16x32xf32>
      %c0_114 = arith.constant 0 : index
      %c0_115 = arith.constant 0 : index
      %295 = vector.load %arg18[%c0_114, %c0_115] : memref<1x32xf32, #tpu.memory_space<vmem>>, vector<1x32xf32>
      %296 = vector.broadcast %295 : vector<1x32xf32> to vector<16x32xf32>
      %297 = arith.mulf %296, %293 : vector<16x32xf32>
      %298 = arith.addf %294, %297 : vector<16x32xf32>
      %c0_116 = arith.constant 0 : index
      %c0_117 = arith.constant 0 : index
      %c0_118 = arith.constant 0 : index
      %299 = vector.load %arg20[%c0_116, %c0_117, %c0_118] : memref<1x16x32xf32, #tpu.memory_space<vmem>>, vector<1x16x32xf32>
      %300 = vector.shape_cast %299 : vector<1x16x32xf32> to vector<16x32xf32>
      %301 = vector.shape_cast %298 : vector<16x32xf32> to vector<1x16x32xf32>
      tpu.vector_store %arg20[%c0_116, %c0_117, %c0_118], %301 {strides = array<i32>} : memref<1x16x32xf32, #tpu.memory_space<vmem>>, vector<1x16x32xf32>,
    } else {
    }
    return
  }
  func.func @transform_0(%arg0: i32, %arg1: i32) -> (i32, i32, i32) {
    %c0_i32 = arith.constant 0 : i32
    %c0_i32_0 = arith.constant 0 : i32
    return %arg0, %arg1, %c0_i32 : i32, i32, i32
  }
  func.func @transform_1(%arg0: i32, %arg1: i32) -> (i32, i32, i32) {
    %c0_i32 = arith.constant 0 : i32
    %c0_i32_0 = arith.constant 0 : i32
    %c0_i32_1 = arith.constant 0 : i32
    return %arg0, %c0_i32, %c0_i32_0 : i32, i32, i32
  }
  func.func @transform_2(%arg0: i32, %arg1: i32) -> (i32, i32, i32) {
    %c0_i32 = arith.constant 0 : i32
    %c0_i32_0 = arith.constant 0 : i32
    %c0_i32_1 = arith.constant 0 : i32
    return %arg0, %c0_i32, %c0_i32_0 : i32, i32, i32
  }
  func.func @transform_3(%arg0: i32, %arg1: i32) -> (i32, i32) {
    %c0_i32 = arith.constant 0 : i32
    %c0_i32_0 = arith.constant 0 : i32
    %c0_i32_1 = arith.constant 0 : i32
    return %c0_i32, %c0_i32_0 : i32, i32
  }
  func.func @transform_4(%arg0: i32, %arg1: i32) -> (i32, i32) {
    %c0_i32 = arith.constant 0 : i32
    %c0_i32_0 = arith.constant 0 : i32
    %c0_i32_1 = arith.constant 0 : i32
    return %c0_i32, %c0_i32_0 : i32, i32
  }
  func.func @transform_5(%arg0: i32, %arg1: i32) -> (i32, i32) {
    %c0_i32 = arith.constant 0 : i32
    %c0_i32_0 = arith.constant 0 : i32
    %c0_i32_1 = arith.constant 0 : i32
    return %c0_i32, %c0_i32_0 : i32, i32
  }
  func.func @transform_6(%arg0: i32, %arg1: i32) -> (i32, i32) {
    %c0_i32 = arith.constant 0 : i32
    %c0_i32_0 = arith.constant 0 : i32
    %c0_i32_1 = arith.constant 0 : i32
    return %c0_i32, %c0_i32_0 : i32, i32
  }
  func.func @transform_7(%arg0: i32, %arg1: i32) -> (i32, i32) {
    %c0_i32 = arith.constant 0 : i32
    %c0_i32_0 = arith.constant 0 : i32
    %c0_i32_1 = arith.constant 0 : i32
    return %c0_i32, %c0_i32_0 : i32, i32
  }
  func.func @transform_8(%arg0: i32, %arg1: i32) -> (i32, i32) {
    %c0_i32 = arith.constant 0 : i32
    %c0_i32_0 = arith.constant 0 : i32
    %c0_i32_1 = arith.constant 0 : i32
    return %c0_i32, %c0_i32_0 : i32, i32
  }
  func.func @transform_9(%arg0: i32, %arg1: i32) -> (i32, i32) {
    %c0_i32 = arith.constant 0 : i32
    %c0_i32_0 = arith.constant 0 : i32
    %c0_i32_1 = arith.constant 0 : i32
    return %c0_i32, %c0_i32_0 : i32, i32
  }
  func.func @transform_10(%arg0: i32, %arg1: i32) -> (i32, i32) {
    %c0_i32 = arith.constant 0 : i32
    %c0_i32_0 = arith.constant 0 : i32
    %c0_i32_1 = arith.constant 0 : i32
    return %c0_i32, %c0_i32_0 : i32, i32
  }
  func.func @transform_11(%arg0: i32, %arg1: i32) -> (i32, i32) {
    %c0_i32 = arith.constant 0 : i32
    %c0_i32_0 = arith.constant 0 : i32
    %c0_i32_1 = arith.constant 0 : i32
    return %c0_i32, %c0_i32_0 : i32, i32
  }
  func.func @transform_12(%arg0: i32, %arg1: i32) -> (i32, i32) {
    %c0_i32 = arith.constant 0 : i32
    %c0_i32_0 = arith.constant 0 : i32
    %c0_i32_1 = arith.constant 0 : i32
    return %c0_i32, %c0_i32_0 : i32, i32
  }
  func.func @transform_13(%arg0: i32, %arg1: i32) -> (i32, i32) {
    %c0_i32 = arith.constant 0 : i32
    %c0_i32_0 = arith.constant 0 : i32
    %c0_i32_1 = arith.constant 0 : i32
    return %c0_i32, %c0_i32_0 : i32, i32
  }
  func.func @transform_14(%arg0: i32, %arg1: i32) -> (i32, i32) {
    %c0_i32 = arith.constant 0 : i32
    %c0_i32_0 = arith.constant 0 : i32
    %c0_i32_1 = arith.constant 0 : i32
    return %c0_i32, %c0_i32_0 : i32, i32
  }
  func.func @transform_15(%arg0: i32, %arg1: i32) -> (i32, i32) {
    %c0_i32 = arith.constant 0 : i32
    %c0_i32_0 = arith.constant 0 : i32
    %c0_i32_1 = arith.constant 0 : i32
    return %c0_i32, %c0_i32_0 : i32, i32
  }
  func.func @transform_16(%arg0: i32, %arg1: i32) -> (i32, i32) {
    %c0_i32 = arith.constant 0 : i32
    %c0_i32_0 = arith.constant 0 : i32
    %c0_i32_1 = arith.constant 0 : i32
    return %c0_i32, %c0_i32_0 : i32, i32
  }
  func.func @transform_17(%arg0: i32, %arg1: i32) -> (i32, i32, i32) {
    %c0_i32 = arith.constant 0 : i32
    %c0_i32_0 = arith.constant 0 : i32
    return %arg0, %arg1, %c0_i32 : i32, i32, i32
  }
  func.func @transform_18(%arg0: i32, %arg1: i32) -> (i32, i32, i32) {
    %c0_i32 = arith.constant 0 : i32
    %c0_i32_0 = arith.constant 0 : i32
    %c0_i32_1 = arith.constant 0 : i32
    return %arg0, %c0_i32, %c0_i32_0 : i32, i32, i32
  }
}

</mosaic_0001>

<bundles_post_ra>
// kernel: tpu_custom_call.1
= control target key start
LH: loop header
LB: loop body
LE: loop exit
PB: predicated region body
PF: predicated region fallthrough
CT: control target
= control target key end

     0   :  { %s3279_s0 = inlined_call_operand.vmem [shape: f32[2,64,32], index: 0, kind: input, shape index: {}]   ;;  %s3280_s1 = inlined_call_operand.vmem [shape: f32[2,16,32], index: 1, kind: input, shape index: {}]   ;;  %s3281_s2 = inlined_call_operand.vmem [shape: f32[2,1,16], index: 2, kind: input, shape index: {}]   ;;  %s3282_s3 = inlined_call_operand.vmem [shape: f32[1,32], index: 3, kind: input, shape index: {}]   ;;  %s3283_s4 = inlined_call_operand.vmem [shape: f32[1,32], index: 4, kind: input, shape index: {}]   ;;  %s3284_s5 = inlined_call_operand.vmem [shape: f32[1,32], index: 5, kind: input, shape index: {}]   ;;  %s3285_s6 = inlined_call_operand.vmem [shape: f32[1,32], index: 6, kind: input, shape index: {}]   ;;  %s3286_s7 = inlined_call_operand.vmem [shape: bf16[32,64], index: 7, kind: input, shape index: {}]   ;;  %s3287_s8 = inlined_call_operand.vmem [shape: f32[1,64], index: 8, kind: input, shape index: {}]   ;;  %s3288_s9 = inlined_call_operand.vmem [shape: bf16[32,64], index: 9, kind: input, shape index: {}]   ;;  %s3289_s10 = inlined_call_operand.vmem [shape: f32[1,64], index: 10, kind: input, shape index: {}]   ;;  %s3290_s11 = inlined_call_operand.vmem [shape: bf16[32,32], index: 11, kind: input, shape index: {}]   ;;  %s3291_s12 = inlined_call_operand.vmem [shape: f32[1,32], index: 12, kind: input, shape index: {}]   ;;  %s3292_s13 = inlined_call_operand.vmem [shape: bf16[32,32], index: 13, kind: input, shape index: {}]   ;;  %s3293_s14 = inlined_call_operand.vmem [shape: f32[1,32], index: 14, kind: input, shape index: {}]   ;;  %s3294_s15 = inlined_call_operand.vmem [shape: f32[1,32], index: 15, kind: input, shape index: {}]   ;;  %s3295_s16 = inlined_call_operand.vmem [shape: f32[1,32], index: 16, kind: input, shape index: {}]   ;;  %s3296_s17 = inlined_call_operand.vmem [shape: f32[2,64,32], index: 17, kind: output, shape index: {0}]   ;;  %s3297_s18 = inlined_call_operand.hbm [shape: f32[2,16,32], index: 18, kind: output, shape index: {1}]  }
   0x1   :  { %3314 = sst [smem:[#allocation24_spill]] %s3279_s0 }
   0x2   :  { %3315 = sst [smem:[#allocation25_spill]] %s3280_s1 }
   0x3   :  { %3316 = sst [smem:[#allocation26_spill]] %s3281_s2 }
   0x4   :  { %3317 = sst [smem:[#allocation27_spill]] %s3287_s8 }
   0x5   :  { %3318 = sst [smem:[#allocation28_spill]] %s3290_s11 }
   0x6   :  { %3319 = sst [smem:[#allocation29_spill]] %s3291_s12 }
   0x7   :  { %3320 = sst [smem:[#allocation30_spill]] %s3292_s13 }
   0x8   :  { %3321 = sst [smem:[#allocation31_spill]] %s3293_s14 }
   0x9   :  { %3322 = sst [smem:[#allocation32_spill]] %s3294_s15 }
   0xa   :  { %3323 = sst [smem:[#allocation33_spill]] %s3295_s16 }
   0xb   :  { %3324 = sst [smem:[#allocation34_spill]] %s3297_s18 }
   0xc   :  { %24 = vsyncpa [#allocation10], 0 }
   0xd   :  { %26 = vsyncpa [#allocation10 + $0x1], 0  ;;  %s2680_s27 = smov 0   ;;  %s2682_s28 = smov 0  }
   0xe   :  { %s2684_s29 = smov 0   ;;  %s2686_s30 = smov 0  }
   0xf   :  { %s2688_s0 = smov 0   ;;  %s2690_s19 = smov 0  }
  0x10   :  { %s2692_s1 = smov 0   ;;  %s2694_s20 = smov 0  }
  0x11 LB: > { %3325 = sst [smem:[#allocation12_spill]] %s2531_s27  ;;  %s2147_s21 = sadd.s32 4294967295, %s2559_s20   ;;  %s2559_s20 = sphi %s2694_s20, %s32_s20   ;;  %s2555_s1 = sphi %s2692_s1, %s3366_s1   ;;  %s2551_s19 = sphi %s2690_s19, %s3365_s19   ;;  %s2547_s0 = sphi %s2688_s0, %s3364_s0   ;;  %s2543_s30 = sphi %s2686_s30, %s3363_s30   ;;  %s2539_s29 = sphi %s2684_s29, %s3362_s29   ;;  %s2535_s28 = sphi %s2682_s28, %s3361_s28   ;;  %s2531_s27 = sphi %s2680_s27, %s3360_s27  }
  0x12   : > { %3326 = sst [smem:[#allocation13_spill]] %s2535_s28  ;;  %s2148_s22 = sadd.s32 4294967294, %s2559_s20  }
  0x13   : > { %3327 = sst [smem:[#allocation14_spill]] %s2539_s29  ;;  %s41_s2 = sadd.s32 1, %s2551_s19 }
  0x14   : > { %3328 = sst [smem:[#allocation15_spill]] %s2547_s0  ;;  %p42_p0 = scmp.ge.s32.totalorder %s41_s2, 4 }
  0x15   : > { %3329 = sst [smem:[#allocation16_spill]] %s2551_s19  ;;  %s44_s23 = sadd.s32 1, %s2555_s1 }
  0x16   : > { %3330 = sst [smem:[#allocation17_spill]] %s2555_s1  ;;  %p463_p1 = scmp.ne.s32.totalorder %s2539_s29, %s2535_s28 }
  0x17   : > { %3331 = sst [smem:[#allocation18_spill]] %s2559_s20  ;;  %p464_p2 = scmp.eq.s32.totalorder %s2147_s21, 7 }
  0x18   : > { %s3368_s2 = smov (%p42_p0, %s41_s2), 0  ;;  %s3370_s23 = smov (!%p42_p0, %s44_s23), %s2555_s1 }
  0x19   : > { %3332 = sst [smem:[#allocation19_spill]] %s3368_s2  ;;  %p2729_p3 = por %p464_p2, %p463_p1 }
  0x1a   : > { %p469_p4 = scmp.ne.s32.totalorder %s2535_s28, %s2531_s27  ;;  %p46_p5 = scmp.ge.s32.totalorder %s3370_s23, 2 }
  0x1b   : > { %s3333_s24 = scalar_select %p2729_p3, 1, 0 }
  0x1c   : > { %p470_p6 = scmp.eq.s32.totalorder %s2148_s22, 7  ;;  %p2151_p7 = scmp.ge.s32.totalorder %s2559_s20, 1 }
  0x1d   : > { %3334 = sst [smem:[#allocation20_spill]] %s3333_s24  ;;  %p557_p8 = scmp.lt.s32.totalorder %s2559_s20, 9 }
  0x1e   : > { %s3372_s23 = smov (%p46_p5, %s3370_s23), 0  ;;  %p2739_p9 = por %p470_p6, %p469_p4 }
  0x1f   : > { %3335 = sst [smem:[#allocation21_spill]] %s3372_s23  ;;  %p558_p10 = pnand %p2151_p7, %p557_p8 }
  0x20   : > { %s3336_s25 = scalar_select %p2739_p9, 1, 0 }
  0x21   : > { %s450_s26 = ssub.s32 %s2555_s1, %s3372_s23  ;;  %s453_s21 = sadd.s32 1, %s2539_s29 }
  0x22   : > { %3337 = sst [smem:[#allocation22_spill]] %s3336_s25  ;;  %p451_p11 = scmp.eq.s32.totalorder %s450_s26, 0 }
  0x23   : > { %561 = sbr.rel (%p558_p10) target bundleno = 2244 (0x8c4), region = 88  ;;  %s3310_s22 = sand.u32 (!%p558_p10), 1, %s2535_s28  }
  0x24   : > { %s2747_s2 = scalar_select %p451_p11, %s2539_s29, %s453_s21  }
  0x25   : > { %s2153_s19 = sshll.u32 (!%p558_p10), %s2543_s30, 1  ;;  %s2152_s27 = sshll.u32 (!%p558_p10), %s3310_s22, 4 }
  0x26   : > { %3338 = sst [smem:[#allocation23_spill]] %s2747_s2  ;;  %p633_p12 = scmp.lt.s32.totalorder (!%p558_p10), %s2547_s0, 1 }
  0x27   : > { %p635_p13 = scmp.lt.s32.totalorder (!%p558_p10), %s2153_s19, 7  ;;  %s3339_s29 = sld [smem:[#allocation25_spill]] (!%p558_p10) }
  0x28   : > { %s2755_s20 = scalar_select %p633_p12, %s2547_s0, 1 }
  0x29   : > { %s3374_s19 = smov (!%p635_p13, %s2153_s19), 7  ;;  %s3340_s28 = sld [smem:[#allocation26_spill]] }
  0x2a   : > { %s2154_s26 = sshll.u32 %s2755_s20, 3  ;;  %s2248_s21 = sshll.u32 %s2755_s20, 4 }
  0x2b   : > { %s638_s23 = sadd.s32 %s2154_s26, %s3374_s19  ;;  %s3341_s0 = sld [smem:[#allocation24_spill]] }
  0x2c   : > { %s2155_s18 = sshll.u32 %s638_s23, 3  ;;  %s2776_s19 = scalar_lea.vmem [#allocation9], %s2152_s27 }
  0x2d   : > { %s646_s25 = scalar_lea.vmem %s3339_s29, %s2248_s21  ;;  %s2774_s8 = scalar_lea.vmem %s3296_s17, %s2155_s18 }
  0x2e   : > { %p2161_p0 = scmp.ne.s32.totalorder %s2543_s30, 0 }
  0x2f   : > { %s649_s22 = scalar_lea.vmem %s3340_s28, %s2755_s20  ;;  %s2564_s1 = smov (!%p2161_p0), 96  }
  0x30   : > { %664 = sbr.rel (%p2161_p0) target bundleno = 562 (0x232), region = 92 }
  0x31   : > { %s2769_s15 = scalar_lea.vmem %s3341_s0, %s2155_s18 }
  0x35   : > { %v665_v0 = vld [vmem:[%s646_s25] sm:$0xff]  ;;  %vm669_vm0 = vcmask 261120   ;;  %vm786_vm1 = vcmask 31744   ;;  %v2561_v2 = vmov -inf   ;;  %v2562_v3 = vmov 0.0   ;;  %v666_v4 = vld [vmem:[%s646_s25 + $0x8] sm:$0xff] }
  0x36   : > { %v670_v1 = vsel %vm669_vm0, %v665_v0, 0.0  ;;  %787 = vst.msk [vmem:[#allocation5] sm:$0xff] %vm786_vm1, %v2561_v2  ;;  %v673_v5 = vsel %vm669_vm0, %v666_v4, 0.0  ;;  %v2563_v6 = vmov 32.0   ;;  %v2250_v23 = vld [vmem:[%s3288_s9 + $0x8] sm:$0xff]  ;;  %v2249_v25 = vld [vmem:[%s3288_s9] sm:$0xff] }
  0x37   : > { %788 = vst.msk [vmem:[#allocation5 + $0x8] sm:$0xff] %vm786_vm1, %v2561_v2  ;;  %671 = vadd.xlane.f32.xlu0 %v670_v1  ;;  %2359 = vrcp.f32 %v2563_v6  ;;  %763 = vmatpush.bf16.msra.mxu0 %v2250_v23  ;;  %v2356_v39 = vld [vmem:[%s3284_s5] ss:$0 sm:$0xff]  ;;  %vm773_vm9 = vcmask 257024  }
  0x38   : > { %789 = vst.msk [vmem:[#allocation6] sm:$0xff] %vm786_vm1, %v2562_v3  ;;  %v2357_v43 = vld [vmem:[%s3285_s6] ss:$0 sm:$0xff] }
  0x39   : > { %790 = vst.msk [vmem:[#allocation6 + $0x8] sm:$0xff] %vm786_vm1, %v2562_v3  ;;  %v2358_v54 = vld [vmem:[%s3289_s10] ss:$0 sm:$0xff] }
  0x3a   : > { %791 = vst.msk [vmem:[#allocation7] sm:$0xff] %vm669_vm0, %v2562_v3 }
  0x3b   : > { %792 = vst.msk [vmem:[#allocation7 + $0x8] sm:$0xff] %vm669_vm0, %v2562_v3  ;;  %764 = vmatpush.bf16.msra.mxu0 %v2249_v25 }
  0x3d   : > { %v2360_v7 = vpop.eup %2359 }
  0x3e   : > { %v677_v8 = vmul.f32 32.0, %v2360_v7  ;;  %vm681_vm2 = vweird.f32 %v2360_v7 }
  0x3f   : > { %674 = vadd.xlane.f32.xlu0 %v673_v5 }
  0x40   : > { %v678_v9 = vsub.f32 1.0, %v677_v8 }
  0x42   : > { %v679_v10 = vmul.f32 %v2360_v7, %v678_v9 }
  0x44   : > { %v680_v11 = vadd.f32 %v2360_v7, %v679_v10 }
  0x46   : > { %v682_v12 = vsel %vm681_vm2, %v2360_v7, %v680_v11 }
  0xaa   : > { %v672_v13 = vpop.xlane.xlu0 %671 }
  0xab   : > { %v683_v14 = vmul.f32 %v682_v12, %v672_v13 }
  0xad   : > { %v685_v15 = vsub.f32 %v665_v0, %v683_v14 }
  0xaf   : > { %v687_v16 = vmul.f32 %v685_v15, %v685_v15 }
  0xb1   : > { %v689_v17 = vsel %vm669_vm0, %v687_v16, 0.0 }
  0xb2   : > { %690 = vadd.xlane.f32.xlu1 %v689_v17  ;;  %v675_v18 = vpop.xlane.xlu0 %674 }
  0xb3   : > { %v684_v19 = vmul.f32 %v682_v12, %v675_v18 }
  0xb5   : > { %v686_v20 = vsub.f32 %v666_v4, %v684_v19 }
  0xb7   : > { %v688_v21 = vmul.f32 %v686_v20, %v686_v20 }
  0xb9   : > { %v692_v22 = vsel %vm669_vm0, %v688_v21, 0.0 }
  0xba   : > { %693 = vadd.xlane.f32.xlu1 %v692_v22 }
 0x125   : > { %v691_v24 = vpop.xlane.xlu1 %690 }
 0x126   : > { %v695_v26 = vmul.f32 %v691_v24, %v682_v12 }
 0x128   : > { %v697_v27 = vadd.f32 1e-05, %v695_v26 }
 0x12a   : > { %2361 = vrsqrt.f32 %v697_v27  ;;  %vm705_vm4 = vweird.f32 %v697_v27 }
 0x12d   : > { %v694_v28 = vpop.xlane.xlu1 %693 }
 0x12e   : > { %v696_v29 = vmul.f32 %v694_v28, %v682_v12 }
 0x130   : > { %v2362_v30 = vpop.eup %2361  ;;  %v698_v31 = vadd.f32 1e-05, %v696_v29 }
 0x131   : > { %v700_v32 = vmul.f32 %v2362_v30, %v697_v27  ;;  %vm706_vm3 = vweird.f32 %v2362_v30 }
 0x132   : > { %2363 = vrsqrt.f32 %v698_v31  ;;  %vm707_vm5 = vmor %vm705_vm4, %vm706_vm3  ;;  %vm715_vm7 = vweird.f32 %v698_v31 }
 0x133   : > { %v701_v33 = vmul.f32 %v2362_v30, %v700_v32 }
 0x135   : > { %v702_v34 = vmul.f32 0.5, %v701_v33 }
 0x137   : > { %v703_v35 = vsub.f32 1.5, %v702_v34 }
 0x138   : > { %v2364_v36 = vpop.eup %2363 }
 0x139   : > { %v704_v37 = vmul.f32 %v2362_v30, %v703_v35  ;;  %v710_v38 = vmul.f32 %v2364_v36, %v698_v31  ;;  %vm716_vm6 = vweird.f32 %v2364_v36 }
 0x13a   : > { %vm717_vm8 = vmor %vm715_vm7, %vm716_vm6 }
 0x13b   : > { %v708_v40 = vsel %vm707_vm5, %v2362_v30, %v704_v37  ;;  %v711_v41 = vmul.f32 %v2364_v36, %v710_v38 }
 0x13c   : > { %v719_v42 = vmul.f32 %v708_v40, %v685_v15 }
 0x13d   : > { %v712_v44 = vmul.f32 0.5, %v711_v41 }
 0x13e   : > { %v724_v45 = vmul.f32 %v2356_v39, %v719_v42 }
 0x13f   : > { %v713_v46 = vsub.f32 1.5, %v712_v44 }
 0x140   : > { %v729_v47 = vadd.f32 %v2357_v43, %v724_v45 }
 0x141   : > { %v714_v48 = vmul.f32 %v2364_v36, %v713_v46 }
 0x142   : > { %731 = vst.msk [vmem:[#allocation2] sm:$0xff] %vm669_vm0, %v729_v47 }
 0x143   : > { %v718_v49 = vsel %vm717_vm8, %v2364_v36, %v714_v48 }
 0x144   : > { %v720_v50 = vmul.f32 %v718_v49, %v686_v20 }
 0x146   : > { %v725_v51 = vmul.f32 %v2356_v39, %v720_v50 }
 0x148   : > { %v730_v52 = vadd.f32 %v2357_v43, %v725_v51 }
 0x14a   : > { %732 = vst.msk [vmem:[#allocation2 + $0x8] sm:$0xff] %vm669_vm0, %v730_v52  ;;  %v733_v53 = vpack.c.bf16 %v730_v52, %v729_v47 }
 0x14c   : > { %2170 = vmatmul.msk.bf16.vlgmr.msra.gmra.mxu0 %vm669_vm0, %v733_v53 }
 0x1c9   : > { %v766_v55 = vpop.f32.mrf.mxu0 }
 0x1ca   : > { %v767_v56 = vadd.f32 %v2358_v54, %v766_v55 }
 0x1cc   : > { %v771_v57 = vpack.c.bf16 %v767_v56, %v767_v56 }
 0x1ce   : > { %774 = vst.msk [vmem:[#allocation3] sm:$0xf] %vm773_vm9, %v771_v57  ;;  %778 = vrot.lane.b32.xlu2 %v771_v57, %s2564_s1 }
 0x1d1   : > { %v768_v58 = vpop.f32.mrf.mxu0 }
 0x1d2   : > { %v769_v59 = vadd.f32 %v2358_v54, %v768_v58 }
 0x1d4   : > { %v772_v60 = vpack.c.bf16 %v769_v59, %v769_v59 }
 0x1d6   : > { %775 = vst.msk [vmem:[#allocation3 + $0x4] sm:$0xf] %vm773_vm9, %v772_v60  ;;  %780 = vrot.lane.b32.xlu2 %v772_v60, %s2564_s1 }
 0x228   : > { %v779_v61 = vpop.permute.xlu2 %778 }
 0x229   : > { %784 = vst.msk [vmem:[#allocation4] sm:$0xf] %vm773_vm9, %v779_v61 }
 0x230   : > { %v781_v62 = vpop.permute.xlu2 %780 }
 0x231   : > { %785 = vst.msk [vmem:[#allocation4 + $0x4] sm:$0xf] %vm773_vm9, %v781_v62 }
 0x232 PF: > { %v793_v63 = vld [vmem:[%s2769_s15] sm:$0xff]  ;;  %vm797_vm10 = vcmask 261120   ;;  %v794_v1 = vld [vmem:[%s2769_s15 + $0x8] sm:$0xff]  ;;  %v2565_v3 = vmov 32.0   ;;  %v2253_v51 = vld [vmem:[#allocation3] sm:$0xff]  ;;  %vm920_vm2 = vcmask 64512  }
 0x233   : > { %v798_v0 = vsel %vm797_vm10, %v793_v63, 0.0  ;;  %v801_v2 = vsel %vm797_vm10, %v794_v1, 0.0  ;;  %2384 = vrcp.f32 %v2565_v3  ;;  %v2252_v20 = vld [vmem:[%s3286_s7 + $0x8] sm:$0xff]  ;;  %v2251_v22 = vld [vmem:[%s3286_s7] sm:$0xff]  ;;  %s2566_s12 = smov 120   ;;  %s2567_s13 = smov 112  }
 0x234   : > { %799 = vadd.xlane.f32.xlu0 %v798_v0  ;;  %889 = vmatpush.bf16.msra.mxu0 %v2252_v20  ;;  %v2378_v41 = vld [vmem:[%s3282_s3] ss:$0 sm:$0xff]  ;;  %v925_v52 = vsel %vm920_vm2, %v2253_v51, 0  ;;  %s3342_s18 = sld [smem:[#allocation27_spill]]  ;;  %s2568_s27 = smov 104   ;;  %vm950_vm3 = vcmask 130048  }
 0x235   : > { %v2379_v46 = vld [vmem:[%s3283_s4] ss:$0 sm:$0xff]  ;;  %1122 = vrot.lane.b32.xlu2 %v2253_v51, %s2566_s12  ;;  %934 = vmatpush.bf16.xpose.msra.mxu1 %v925_v52  ;;  %s2570_s20 = smov 96   ;;  %s2574_s1 = smov 88  }
 0x236   : > { %s2576_s15 = smov 8   ;;  %s2577_s2 = smov 72  }
 0x237   : > { %s2578_s23 = smov 24   ;;  %s2579_s24 = smov 16  }
 0x238   : > { %890 = vmatpush.bf16.msra.mxu0 %v2251_v22  ;;  %v2254_v0 = vld [vmem:[#allocation4] sm:$0xff]  ;;  %s3344_s21 = sld [smem:[#allocation28_spill]]  ;;  %p2229_p1 = scmp.ne.s32.totalorder %s2543_s30, 3 }
 0x239   : > { %v2385_v4 = vpop.eup %2384  ;;  %986 = vmatpush.bf16.msra.mxu2 %v2254_v0  ;;  %s3345_s16 = sld [smem:[#allocation29_spill]] }
 0x23a   : > { %v805_v5 = vmul.f32 32.0, %v2385_v4  ;;  %vm809_vm11 = vweird.f32 %v2385_v4  ;;  %v2380_v54 = vld [vmem:[%s3342_s18] ss:$0 sm:$0xff]  ;;  %s3346_s28 = sld [smem:[#allocation32_spill]] }
 0x23b   : > { %s3347_s29 = sld [smem:[#allocation30_spill]] (!%p2229_p1) }
 0x23c   : > { %802 = vadd.xlane.f32.xlu0 %v801_v2  ;;  %v806_v6 = vsub.f32 1.0, %v805_v5  ;;  %s3350_s26 = sld [smem:[#allocation33_spill]] (!%p2229_p1) }
 0x23e   : > { %v807_v7 = vmul.f32 %v2385_v4, %v806_v6 }
 0x240   : > { %v808_v8 = vadd.f32 %v2385_v4, %v807_v7 }
 0x242   : > { %v810_v9 = vsel %vm809_vm11, %v2385_v4, %v808_v8 }
 0x250   : > { %1326 = vrot.lane.b32.xlu0 %v2253_v51, %s2567_s13 }
 0x2a7   : > { %v800_v10 = vpop.xlane.xlu0 %799 }
 0x2a8   : > { %v811_v11 = vmul.f32 %v810_v9, %v800_v10 }
 0x2aa   : > { %v813_v12 = vsub.f32 %v793_v63, %v811_v11 }
 0x2ac   : > { %v815_v13 = vmul.f32 %v813_v12, %v813_v12 }
 0x2ae   : > { %v817_v14 = vsel %vm797_vm10, %v815_v13, 0.0 }
 0x2af   : > { %818 = vadd.xlane.f32.xlu1 %v817_v14  ;;  %v803_v15 = vpop.xlane.xlu0 %802  ;;  %v2857_v14 = vld [vmem:[%s649_s22] ss:$0 sm:$0xff]  ;;  %s2571_s22 = smov 80  }
 0x2b0   : > { %v812_v16 = vmul.f32 %v810_v9, %v803_v15 }
 0x2b2   : > { %v814_v17 = vsub.f32 %v794_v1, %v812_v16  ;;  %v1123_v1 = vpop.permute.xlu2 %1122 }
 0x2b3   : > { %v1128_v2 = vsel %vm920_vm2, %v1123_v1, 0 }
 0x2b4   : > { %v816_v18 = vmul.f32 %v814_v17, %v814_v17  ;;  %1137 = vmatpush.bf16.xpose.msrb.mxu0 %v1128_v2 }
 0x2b6   : > { %v820_v19 = vsel %vm797_vm10, %v816_v18, 0.0 }
 0x2b7   : > { %821 = vadd.xlane.f32.xlu1 %v820_v19 }
 0x2c2   : > { %v1327_v3 = vpop.permute.xlu0 %1326 }
 0x2c3   : > { %v1332_v4 = vsel %vm920_vm2, %v1327_v3, 0 }
 0x322   : > { %v819_v21 = vpop.xlane.xlu1 %818 }
 0x323   : > { %v823_v23 = vmul.f32 %v819_v21, %v810_v9 }
 0x325   : > { %v825_v24 = vadd.f32 1e-05, %v823_v23 }
 0x327   : > { %2386 = vrsqrt.f32 %v825_v24  ;;  %vm833_vm13 = vweird.f32 %v825_v24 }
 0x32a   : > { %v822_v25 = vpop.xlane.xlu1 %821 }
 0x32b   : > { %v824_v26 = vmul.f32 %v822_v25, %v810_v9 }
 0x32d   : > { %v2387_v27 = vpop.eup %2386  ;;  %v826_v28 = vadd.f32 1e-05, %v824_v26 }
 0x32e   : > { %v828_v29 = vmul.f32 %v2387_v27, %v825_v24  ;;  %vm834_vm12 = vweird.f32 %v2387_v27 }
 0x32f   : > { %2388 = vrsqrt.f32 %v826_v28  ;;  %vm835_vm14 = vmor %vm833_vm13, %vm834_vm12  ;;  %vm843_vm0 = vweird.f32 %v826_v28  ;;  %vm1774_vm13 = vcmask 7168  }
 0x330   : > { %v829_v30 = vmul.f32 %v2387_v27, %v828_v29 }
 0x332   : > { %v830_v31 = vmul.f32 0.5, %v829_v30 }
 0x334   : > { %v831_v32 = vsub.f32 1.5, %v830_v31 }
 0x335   : > { %v2389_v33 = vpop.eup %2388 }
 0x336   : > { %v832_v34 = vmul.f32 %v2387_v27, %v831_v32  ;;  %v838_v35 = vmul.f32 %v2389_v33, %v826_v28  ;;  %vm844_vm15 = vweird.f32 %v2389_v33 }
 0x337   : > { %vm845_vm1 = vmor %vm843_vm0, %vm844_vm15  ;;  %vm1780_vm15 = vcmask 23552   ;;  %vm1783_vm0 = vcmask 31744  }
 0x338   : > { %v839_v36 = vmul.f32 %v2389_v33, %v838_v35  ;;  %v836_v37 = vsel %vm835_vm14, %v2387_v27, %v832_v34  ;;  %vm1777_vm14 = vcmask 15360  }
 0x339   : > { %v847_v40 = vmul.f32 %v836_v37, %v813_v12 }
 0x33a   : > { %v840_v38 = vmul.f32 0.5, %v839_v36 }
 0x33b   : > { %v852_v45 = vmul.f32 %v2378_v41, %v847_v40 }
 0x33c   : > { %v841_v39 = vsub.f32 1.5, %v840_v38 }
 0x33d   : > { %v2821_v48 = vadd.f32 %v2379_v46, %v852_v45 }
 0x33e   : > { %v842_v42 = vmul.f32 %v2389_v33, %v841_v39 }
 0x340   : > { %v846_v43 = vsel %vm845_vm1, %v2389_v33, %v842_v42 }
 0x341   : > { %v848_v44 = vmul.f32 %v846_v43, %v814_v17 }
 0x343   : > { %v853_v47 = vmul.f32 %v2378_v41, %v848_v44 }
 0x345   : > { %v2823_v49 = vadd.f32 %v2379_v46, %v853_v47 }
 0x347   : > { %v859_v50 = vpack.c.bf16 %v2823_v49, %v2821_v48 }
 0x349   : > { %2179 = vmatmul.msk.bf16.vlgmr.msra.gmra.mxu0 %vm797_vm10, %v859_v50 }
 0x34a   : > { %1341 = vmatpush.bf16.xpose.msra.mxu0 %v1332_v4 }
 0x3c6   : > { %v892_v53 = vpop.f32.mrf.mxu0 }
 0x3c7   : > { %v893_v55 = vadd.f32 %v2380_v54, %v892_v53 }
 0x3c9   : > { %v897_v57 = vpack.c.bf16 %v893_v55, %v893_v55 }
 0x3cb   : > { %v912_v60 = vunpack.c.l.b16 %v897_v57 }
 0x3ce   : > { %v894_v56 = vpop.f32.mrf.mxu0 }
 0x3cf   : > { %v895_v58 = vadd.f32 %v2380_v54, %v894_v56 }
 0x3d1   : > { %v898_v59 = vpack.c.bf16 %v895_v58, %v895_v58 }
 0x3d3   : > { %v913_v61 = vunpack.c.l.b16 %v898_v59 }
 0x3d5   : > { %v2832_v62 = vpack.c.b16 %v913_v61, %v912_v60 }
 0x3d7   : > { %1324 = vrot.lane.b32.xlu1 %v2832_v62, %s2567_s13  ;;  %1120 = vrot.lane.b32.xlu2 %v2832_v62, %s2566_s12  ;;  %v922_v63 = vsel %vm920_vm2, %v2832_v62, 0 }
 0x3d8   : > { %2184 = vmatmul.msk.bf16.vlgmr.msra.gmra.mxu1 %vm920_vm2, %v2832_v62  ;;  %1034 = vmatpush.bf16.xpose.msra.mxu3 %v922_v63 }
 0x3df   : > { %1530 = vrot.lane.b32.xlu2 %v2253_v51, %s2568_s27  ;;  %2192 = vmatmul.msk.bf16.vlgmr.msra.gmra.mxu3 %vm920_vm2, %v2253_v51  ;;  %v2569_v51 = vmov 0  }
 0x3e0   : > { %1373 = vrot.lane.b32.xlu1 %v2254_v0, %s2567_s13  ;;  %2365 = vset.pattern.permute.xlu0 %v2569_v51 }
 0x3e1   : > { %2366 = vset.pattern.permute.xlu1 %v2569_v51 }
 0x3e7   : > { %1528 = vrot.lane.b32.xlu2 %v2832_v62, %s2568_s27 }
 0x3ef   : > { %1169 = vrot.lane.b32.xlu2 %v2254_v0, %s2566_s12 }
 0x3f7   : > { %1577 = vrot.lane.b32.xlu2 %v2254_v0, %s2568_s27 }
 0x431   : > { %v1121_v5 = vpop.permute.xlu2 %1120 }
 0x432   : > { %2196 = vmatmul.msk.bf16.vlgmr.msrb.gmra.mxu0 %vm920_vm2, %v1121_v5  ;;  %v1125_v6 = vsel %vm920_vm2, %v1121_v5, 0 }
 0x433   : > { %1230 = vmatpush.bf16.xpose.msrb.mxu3 %v1125_v6 }
 0x439   : > { %v1531_v7 = vpop.permute.xlu2 %1530 }
 0x43a   : > { %v1536_v8 = vsel %vm920_vm2, %v1531_v7, 0  ;;  %2200 = vmatmul.msk.bf16.vlgmr.msrb.gmra.mxu3 %vm920_vm2, %v1123_v1 }
 0x43b   : > { %1545 = vmatpush.bf16.xpose.msrb.mxu0 %v1536_v8 }
 0x441   : > { %v1529_v9 = vpop.permute.xlu2 %1528 }
 0x442   : > { %v1533_v12 = vsel %vm920_vm2, %v1529_v9, 0 }
 0x449   : > { %v1325_v10 = vpop.permute.xlu1 %1324  ;;  %v1170_v13 = vpop.permute.xlu2 %1169 }
 0x44a   : > { %v1329_v11 = vsel %vm920_vm2, %v1325_v10, 0  ;;  %2204 = vmatmul.msk.bf16.vlgmr.msra.gmra.mxu0 %vm920_vm2, %v1325_v10  ;;  %1182 = vmatpush.bf16.msrb.mxu1 %v1170_v13  ;;  %v2924_v10 = vld [vmem:[#allocation5 + $0x8] sm:$0xff] }
 0x44b   : > { %1434 = vmatpush.bf16.xpose.msra.mxu3 %v1329_v11 }
 0x451   : > { %v2893_v40 = vpop.permute.xlu2 %1577 }
 0x452   : > { %2208 = vmatmul.msk.bf16.vlgmr.msra.gmra.mxu3 %vm920_vm2, %v1327_v3  ;;  %v1374_v41 = vpop.permute.xlu1 %1373 }
 0x453   : > { %1638 = vmatpush.bf16.xpose.msrb.mxu3 %v1533_v12  ;;  %1386 = vmatpush.bf16.msra.mxu1 %v1374_v41 }
 0x455   : > { %v936_v15 = vpop.f32.mrf.mxu1 }
 0x456   : > { %v2185_v16 = vclamps-f32 %v936_v15, 50000.0 }
 0x458   : > { %v948_v17 = vadd.f32 %v2857_v14, %v2185_v16 }
 0x45a   : > { %v951_v18 = vsel %vm950_vm3, %v948_v17, -inf  ;;  %2212 = vmatmul.msk.bf16.vlgmr.msrb.gmra.mxu0 %vm920_vm2, %v1529_v9 }
 0x45b   : > { %952 = vmax.xlane.f32.xlu2 %v951_v18 }
 0x45d   : > { %v938_v19 = vpop.f32.mrf.mxu1 }
 0x45e   : > { %v2186_v20 = vclamps-f32 %v938_v19, 50000.0 }
 0x460   : > { %v949_v21 = vadd.f32 %v2857_v14, %v2186_v20  ;;  %v2942_v20 = vld [vmem:[#allocation5] sm:$0xff] }
 0x462   : > { %v954_v22 = vsel %vm950_vm3, %v949_v21, -inf  ;;  %2216 = vmatmul.msk.bf16.vlgmr.msrb.gmra.mxu3 %vm920_vm2, %v1531_v7  ;;  %v2865_v23 = vpop.f32.mrf.mxu3 }
 0x463   : > { %955 = vmax.xlane.f32.xlu0 %v954_v22  ;;  %v2193_v24 = vclamps-f32 %v2865_v23, 50000.0 }
 0x465   : > { %v1045_v25 = vsel %vm950_vm3, %v2193_v24, -inf }
 0x466   : > { %1046 = vmax.xlane.f32.xlu2 %v1045_v25 }
 0x46a   : > { %v2871_v26 = vpop.f32.mrf.mxu3 }
 0x46b   : > { %v2194_v27 = vclamps-f32 %v2871_v26, 50000.0 }
 0x46d   : > { %v1048_v28 = vsel %vm950_vm3, %v2194_v27, -inf }
 0x46e   : > { %1049 = vmax.xlane.f32.xlu1 %v1048_v28 }
 0x4af   : > { %v1139_v29 = vpop.f32.mrf.mxu0 }
 0x4b0   : > { %v2197_v30 = vclamps-f32 %v1139_v29, 50000.0 }
 0x4b2   : > { %v2878_v31 = vadd.f32 %v2857_v14, %v2197_v30 }
 0x4b4   : > { %v1150_v32 = vsel %vm950_vm3, %v2878_v31, -inf }
 0x4b5   : > { %1151 = vmax.xlane.f32.xlu1 %v1150_v32 }
 0x4b7   : > { %v1141_v33 = vpop.f32.mrf.mxu0 }
 0x4b8   : > { %v2198_v34 = vclamps-f32 %v1141_v33, 50000.0 }
 0x4ba   : > { %v2883_v35 = vadd.f32 %v2857_v14, %v2198_v34 }
 0x4bc   : > { %v1153_v36 = vsel %vm950_vm3, %v2883_v35, -inf }
 0x4bd   : > { %1154 = vmax.xlane.f32.xlu2 %v1153_v36  ;;  %v2887_v37 = vpop.f32.mrf.mxu3 }
 0x4be   : > { %v2201_v38 = vclamps-f32 %v2887_v37, 50000.0 }
 0x4c0   : > { %v1241_v39 = vsel %vm950_vm3, %v2201_v38, -inf }
 0x4c5   : > { %1242 = vmax.xlane.f32.xlu2 %v1241_v39  ;;  %v2900_v46 = vpop.f32.mrf.mxu3  ;;  %v2572_v39 = vmov 1  }
 0x4c7   : > { %v1343_v42 = vpop.f32.mrf.mxu0 }
 0x4c8   : > { %v2205_v43 = vclamps-f32 %v1343_v42, 50000.0 }
 0x4ca   : > { %v2896_v44 = vadd.f32 %v2857_v14, %v2205_v43 }
 0x4cc   : > { %v1354_v45 = vsel %vm950_vm3, %v2896_v44, -inf }
 0x4cd   : > { %1355 = vmax.xlane.f32.xlu1 %v1354_v45 }
 0x4ce   : > { %v953_v47 = vpop.xlane.xlu2 %952 }
 0x4cf   : > { %v957_v50 = vsub.f32 %v948_v17, %v953_v47  ;;  %v1345_v61 = vpop.f32.mrf.mxu0  ;;  %v2202_v47 = vclamps-f32 %v2900_v46, 50000.0 }
 0x4d0   : > { %v2206_v3 = vclamps-f32 %v1345_v61, 50000.0 }
 0x4d1   : > { %v959_v52 = vmul.f32 1.442695, %v957_v50 }
 0x4d2   : > { %v2920_v7 = vadd.f32 %v2857_v14, %v2206_v3 }
 0x4d3   : > { %2390 = vpow2.f32 %v959_v52  ;;  %v1244_v52 = vsel %vm950_vm3, %v2202_v47, -inf }
 0x4d4   : > { %v1357_v9 = vsel %vm950_vm3, %v2920_v7, -inf }
 0x4d5   : > { %v2904_v53 = vpop.f32.mrf.mxu3 }
 0x4d6   : > { %v2209_v54 = vclamps-f32 %v2904_v53, 50000.0  ;;  %v956_v55 = vpop.xlane.xlu0 %955 }
 0x4d7   : > { %v958_v56 = vsub.f32 %v949_v21, %v956_v55  ;;  %v1547_v6 = vpop.f32.mrf.mxu0 }
 0x4d8   : > { %v1445_v57 = vsel %vm950_vm3, %v2209_v54, -inf  ;;  %v2213_v8 = vclamps-f32 %v1547_v6, 50000.0 }
 0x4d9   : > { %v2391_v58 = vpop.eup %2390  ;;  %v961_v59 = vmul.f32 1.442695, %v958_v56  ;;  %1446 = vmax.xlane.f32.xlu1 %v1445_v57  ;;  %v1047_v21 = vpop.xlane.xlu2 %1046 }
 0x4da   : > { %v963_v60 = vsel %vm950_vm3, %v2391_v58, 0.0  ;;  %v2930_v13 = vadd.f32 %v2857_v14, %v2213_v8  ;;  %v2945_v22 = vmax.f32 %v2942_v20, %v1047_v21 }
 0x4db   : > { %2392 = vpow2.f32 %v961_v59  ;;  %964 = vadd.xlane.f32.xlu0 %v963_v60 }
 0x4dc   : > { %v1558_v17 = vsel %vm950_vm3, %v2930_v13, -inf }
 0x4dd   : > { %v2911_v63 = vpop.f32.mrf.mxu3 }
 0x4de   : > { %v2210_v0 = vclamps-f32 %v2911_v63, 50000.0 }
 0x4df   : > { %v1549_v15 = vpop.f32.mrf.mxu0 }
 0x4e0   : > { %v1448_v1 = vsel %vm950_vm3, %v2210_v0, -inf  ;;  %v2214_v16 = vclamps-f32 %v1549_v15, 50000.0 }
 0x4e1   : > { %v2393_v2 = vpop.eup %2392  ;;  %1449 = vmax.xlane.f32.xlu2 %v1448_v1  ;;  %v1050_v11 = vpop.xlane.xlu1 %1049 }
 0x4e2   : > { %v966_v4 = vsel %vm950_vm3, %v2393_v2, 0.0  ;;  %v969_v5 = vpack.c.bf16 %v2393_v2, %v2391_v58  ;;  %v2927_v12 = vmax.f32 %v2924_v10, %v1050_v11  ;;  %v2936_v18 = vadd.f32 %v2857_v14, %v2214_v16 }
 0x4e3   : > { %967 = vadd.xlane.f32.xlu0 %v966_v4 }
 0x4e4   : > { %2191 = vmatmul.msk.bf16.vlgmr.msra.gmra.mxu2 %vm950_vm3, %v969_v5  ;;  %v1561_v19 = vsel %vm950_vm3, %v2936_v18, -inf }
 0x4e5   : > { %v2948_v14 = vpop.f32.mrf.mxu3 }
 0x4e6   : > { %v2217_v25 = vclamps-f32 %v2948_v14, 50000.0 }
 0x4e8   : > { %v1649_v28 = vsel %vm950_vm3, %v2217_v25, -inf }
 0x4eb   : > { %1358 = vmax.xlane.f32.xlu0 %v1357_v9 }
 0x4ed   : > { %v2954_v29 = vpop.f32.mrf.mxu3 }
 0x4ee   : > { %v2218_v30 = vclamps-f32 %v2954_v29, 50000.0 }
 0x4f0   : > { %v1652_v34 = vsel %vm950_vm3, %v2218_v30, -inf }
 0x4f2   : > { %1066 = vperm.xlu1 %2366, %v2927_v12  }
 0x4f3   : > { %1559 = vmax.xlane.f32.xlu0 %v1558_v17 }
 0x4f9   : > { %1098 = vrot.lane.b32.xlu2 %v2832_v62, %s2570_s20 }
 0x4fa   : > { %1498 = vrot.lane.b32.xlu1 %v2832_v62, %s2571_s22  ;;  %s3348_s22 = smov (!%p2229_p1), %s3347_s29 }
 0x4fb   : > { %1562 = vmax.xlane.f32.xlu0 %v1561_v19  ;;  %2367 = vset.pattern.permute.xlu1 %v2572_v39 }
 0x50f   : > { %1061 = vperm.xlu0 %2365, %v2945_v22  }
 0x522   : > { %1650 = vmax.xlane.f32.xlu2 %v1649_v28 }
 0x528   : > { %v1152_v32 = vpop.xlane.xlu1 %1151 }
 0x529   : > { %v1156_v33 = vsub.f32 %v2878_v31, %v1152_v32  ;;  %v2573_v31 = vmov 2  }
 0x52a   : > { %1653 = vmax.xlane.f32.xlu2 %v1652_v34 }
 0x52b   : > { %v1158_v36 = vmul.f32 1.442695, %v1156_v33  ;;  %2369 = vset.pattern.permute.xlu2 %v2573_v31 }
 0x52d   : > { %2394 = vpow2.f32 %v1158_v36 }
 0x530   : > { %v1155_v41 = vpop.xlane.xlu2 %1154 }
 0x531   : > { %v1157_v42 = vsub.f32 %v2883_v35, %v1155_v41 }
 0x533   : > { %v2395_v43 = vpop.eup %2394  ;;  %v1160_v45 = vmul.f32 1.442695, %v1157_v42 }
 0x534   : > { %v1162_v50 = vsel %vm950_vm3, %v2395_v43, 0.0 }
 0x535   : > { %2396 = vpow2.f32 %v1160_v45  ;;  %1163 = vadd.xlane.f32.xlu1 %v1162_v50 }
 0x538   : > { %v1243_v57 = vpop.xlane.xlu2 %1242 }
 0x539   : > { %1245 = vmax.xlane.f32.xlu0 %v1244_v52  ;;  %v2973_v58 = vmax.f32 %v2942_v20, %v1243_v57 }
 0x53b   : > { %v2397_v55 = vpop.eup %2396 }
 0x53c   : > { %v1165_v56 = vsel %vm950_vm3, %v2397_v55, 0.0  ;;  %v1168_v35 = vpack.c.bf16 %v2397_v55, %v2395_v43 }
 0x53d   : > { %1166 = vadd.xlane.f32.xlu2 %v1165_v56 }
 0x53e   : > { %2199 = vmatmul.msk.bf16.vlgmr.msrb.gmra.mxu1 %vm950_vm3, %v1168_v35 }
 0x53f   : > { %1590 = vmatpush.bf16.msrb.mxu1 %v2893_v40 }
 0x540   : > { %v1356_v4 = vpop.xlane.xlu1 %1355 }
 0x541   : > { %v1360_v5 = vsub.f32 %v2896_v44, %v1356_v4 }
 0x543   : > { %v1362_v11 = vmul.f32 1.442695, %v1360_v5 }
 0x54d   : > { %1294 = vrot.lane.b32.xlu0 %v2832_v62, %s2574_s1 }
 0x54e   : > { %v965_v59 = vpop.xlane.xlu0 %964  ;;  %1257 = vperm.xlu1 %2367, %v2973_v58  }
 0x54f   : > { %2398 = vrcp.f32 %v965_v59  ;;  %v1004_v32 = vand.u32 2147483648, %v965_v59  ;;  %vm998_vm5 = vweird.f32 %v965_v59  ;;  %v1002_v33 = vand.u32 2147483647, %v965_v59 }
 0x551   : > { %v1005_v36 = vor.u32 1.1754944e-38, %v1004_v32  ;;  %vm1003_vm7 = vcmp.eq.f32.partialorder %v1002_v33, 8.507059e+37 }
 0x554   : > { %v1450_v60 = vpop.xlane.xlu2 %1449 }
 0x555   : > { %v2399_v61 = vpop.eup %2398  ;;  %v2978_v1 = vmax.f32 %v2924_v10, %v1450_v60 }
 0x556   : > { %v994_v2 = vmul.f32 %v2399_v61, %v965_v59  ;;  %v968_v3 = vpop.xlane.xlu0 %967  ;;  %vm999_vm4 = vweird.f32 %v2399_v61 }
 0x557   : > { %2400 = vrcp.f32 %v968_v3  ;;  %1466 = vperm.xlu2 %2369, %v2978_v1   ;;  %vm1000_vm6 = vmor %vm998_vm5, %vm999_vm4  ;;  %v1019_v55 = vand.u32 2147483648, %v968_v3  ;;  %vm1013_vm9 = vweird.f32 %v968_v3  ;;  %v1017_v57 = vand.u32 2147483647, %v968_v3 }
 0x558   : > { %v995_v40 = vsub.f32 1.0, %v994_v2  ;;  %2402 = vpow2.f32 %v1362_v11 }
 0x559   : > { %v1020_v60 = vor.u32 1.1754944e-38, %v1019_v55  ;;  %vm1018_vm12 = vcmp.eq.f32.partialorder %v1017_v57, 8.507059e+37 }
 0x55a   : > { %v996_v8 = vmul.f32 %v2399_v61, %v995_v40 }
 0x55c   : > { %v1099_v6 = vpop.permute.xlu2 %1098  ;;  %v997_v21 = vadd.f32 %v2399_v61, %v996_v8 }
 0x55d   : > { %v2401_v9 = vpop.eup %2400  ;;  %1111 = vmatpush.bf16.msrb.mxu2 %v1099_v6 }
 0x55e   : > { %v1009_v15 = vmul.f32 %v2401_v9, %v968_v3  ;;  %v1359_v16 = vpop.xlane.xlu0 %1358  ;;  %v1001_v44 = vsel %vm1000_vm6, %v2399_v61, %v997_v21  ;;  %v2403_v45 = vpop.eup %2402  ;;  %vm1014_vm8 = vweird.f32 %v2401_v9  ;;  %v2575_v21 = vmov 3  }
 0x55f   : > { %v1361_v17 = vsub.f32 %v2920_v7, %v1359_v16  ;;  %v1006_v43 = vsel %vm1003_vm7, %v1005_v36, %v1001_v44  ;;  %vm1015_vm11 = vmor %vm1013_vm9, %vm1014_vm8  ;;  %2370 = vset.pattern.permute.xlu2 %v2575_v21  ;;  %2371 = vset.pattern.permute.xlu0 %v2575_v21 }
 0x560   : > { %v1010_v19 = vsub.f32 1.0, %v1009_v15  ;;  %v1447_v15 = vpop.xlane.xlu1 %1446 }
 0x561   : > { %v1364_v28 = vmul.f32 1.442695, %v1361_v17  ;;  %v1366_v17 = vsel %vm950_vm3, %v2403_v45, 0.0 }
 0x562   : > { %v1011_v34 = vmul.f32 %v2401_v9, %v1010_v19 }
 0x563   : > { %2404 = vpow2.f32 %v1364_v28 }
 0x564   : > { %v1012_v7 = vadd.f32 %v2401_v9, %v1011_v34 }
 0x566   : > { %v1560_v41 = vpop.xlane.xlu0 %1559  ;;  %v1016_v59 = vsel %vm1015_vm11, %v2401_v9, %v1012_v7 }
 0x567   : > { %v988_v42 = vpop.f32.mrf.mxu2  ;;  %v1564_v35 = vsub.f32 %v2930_v13, %v1560_v41  ;;  %v1021_v5 = vsel %vm1018_vm12, %v1020_v60, %v1016_v59 }
 0x568   : > { %v1023_v50 = vmul.f32 %v1006_v43, %v988_v42  ;;  %v1067_v28 = vpop.permute.xlu1 %1066 }
 0x569   : > { %v2983_v52 = vpop.eup %2404  ;;  %v1566_v61 = vmul.f32 1.442695, %v1564_v35  ;;  %v1070_v33 = vsub.f32 %v2194_v27, %v1067_v28  ;;  %v3013_v27 = vmax.f32 %v2942_v20, %v1447_v15  ;;  %v1053_v35 = vsub.f32 %v2942_v20, %v2945_v22 }
 0x56a   : > { %v1372_v56 = vpack.c.bf16 %v2983_v52, %v2403_v45  ;;  %v1025_v6 = vpack.c.bf16 %v1023_v50, %v1023_v50 }
 0x56b   : > { %2406 = vpow2.f32 %v1566_v61  ;;  %v1073_v36 = vmul.f32 1.442695, %v1070_v33  ;;  %v1055_v59 = vmul.f32 1.442695, %v1053_v35 }
 0x56c   : > { %2207 = vmatmul.msk.bf16.vlgmr.msra.gmra.mxu1 %vm950_vm3, %v1372_v56  ;;  %v2989_v3 = vunpack.c.l.b16 %v1025_v6 }
 0x56e   : > { %v1563_v2 = vpop.xlane.xlu0 %1562 }
 0x56f   : > { %v1565_v4 = vsub.f32 %v2936_v18, %v1563_v2  ;;  %v990_v40 = vpop.f32.mrf.mxu2  ;;  %v1054_v2 = vsub.f32 %v2924_v10, %v2927_v12 }
 0x570   : > { %v1024_v8 = vmul.f32 %v1021_v5, %v990_v40  ;;  %v1499_v61 = vpop.permute.xlu1 %1498 }
 0x571   : > { %v1568_v11 = vmul.f32 1.442695, %v1565_v4  ;;  %v2407_v18 = vpop.eup %2406  ;;  %v1057_v4 = vmul.f32 1.442695, %v1054_v2 }
 0x572   : > { %v1026_v13 = vpack.c.bf16 %v1024_v8, %v1024_v8  ;;  %v1570_v34 = vsel %vm950_vm3, %v2407_v18, 0.0 }
 0x573   : > { %2408 = vpow2.f32 %v1568_v11 }
 0x574   : > { %v2991_v16 = vunpack.c.l.b16 %v1026_v13  ;;  %2410 = vpow2.f32 %v1073_v36 }
 0x576   : > { %v1736_v9 = vpack.c.b16 %v2991_v16, %v2989_v3 }
 0x577   : > { %1367 = vadd.xlane.f32.xlu0 %v1366_v17 }
 0x579   : > { %v2409_v19 = vpop.eup %2408 }
 0x57a   : > { %v1576_v32 = vpack.c.bf16 %v2409_v19, %v2407_v18  ;;  %v1573_v44 = vsel %vm950_vm3, %v2409_v19, 0.0  ;;  %v3005_v45 = vpop.eup %2410 }
 0x57c   : > { %2215 = vmatmul.msk.bf16.vlgmr.msrb.gmra.mxu1 %vm950_vm3, %v1576_v32 }
 0x57f   : > { %1574 = vadd.xlane.f32.xlu0 %v1573_v44 }
 0x580   : > { %1571 = vadd.xlane.f32.xlu2 %v1570_v34 }
 0x581   : > { %v1062_v41 = vpop.permute.xlu0 %1061 }
 0x582   : > { %v1069_v42 = vsub.f32 %v2193_v24, %v1062_v41  ;;  %v1775_v24 = vsel %vm1774_vm13, %v2945_v22, %v2973_v58 }
 0x583   : > { %v1778_v55 = vsel %vm1777_vm14, %v1775_v24, %v3013_v27 }
 0x584   : > { %v1071_v43 = vmul.f32 1.442695, %v1069_v42 }
 0x586   : > { %2412 = vpow2.f32 %v1071_v43 }
 0x587   : > { %2414 = vpow2.f32 %v1055_v59 }
 0x58c   : > { %v3007_v50 = vpop.eup %2412 }
 0x58d   : > { %v1097_v26 = vpack.c.bf16 %v3005_v45, %v3007_v50  ;;  %v3036_v40 = vpop.eup %2414 }
 0x58f   : > { %2195 = vmatmul.msk.bf16.vlgmr.msrb.gmra.mxu2 %vm950_vm3, %v1097_v26 }
 0x595   : > { %v1651_v23 = vpop.xlane.xlu2 %1650 }
 0x596   : > { %v3019_v7 = vmax.f32 %v2942_v20, %v1651_v23 }
 0x598   : > { %v1781_v56 = vsel %vm1780_vm15, %v1778_v55, %v3019_v7  ;;  %1665 = vperm.xlu2 %2370, %v3019_v7  }
 0x599   : > { %1784 = vst.msk [vmem:[#allocation5] sm:$0xff] %vm1783_vm0, %v1781_v56 }
 0x59d   : > { %v1654_v57 = vpop.xlane.xlu2 %1653 }
 0x59e   : > { %v3030_v60 = vmax.f32 %v2924_v10, %v1654_v57 }
 0x5a0   : > { %1670 = vperm.xlu0 %2371, %v3030_v60   ;;  %2373 = vset.pattern.permute.xlu2 %v2572_v39 }
 0x5a8   : > { %v1164_v5 = vpop.xlane.xlu1 %1163  ;;  %2372 = vset.pattern.permute.xlu0 %v2569_v51 }
 0x5a9   : > { %2416 = vrcp.f32 %v1164_v5  ;;  %1087 = vperm.xlu0 %2372, %v3036_v40   ;;  %v1200_v44 = vand.u32 2147483648, %v1164_v5  ;;  %vm1194_vm4 = vweird.f32 %v1164_v5  ;;  %v1198_v36 = vand.u32 2147483647, %v1164_v5 }
 0x5aa   : > { %2418 = vpow2.f32 %v1057_v4 }
 0x5ab   : > { %v1201_v26 = vor.u32 1.1754944e-38, %v1200_v44  ;;  %vm1199_vm7 = vcmp.eq.f32.partialorder %v1198_v36, 8.507059e+37 }
 0x5ac   : > { %v1246_v22 = vpop.xlane.xlu0 %1245 }
 0x5ad   : > { %v3041_v6 = vmax.f32 %v2924_v10, %v1246_v22 }
 0x5af   : > { %v2417_v8 = vpop.eup %2416  ;;  %v1776_v11 = vsel %vm1774_vm13, %v2927_v12, %v3041_v6  ;;  %1262 = vperm.xlu1 %2367, %v3041_v6  }
 0x5b0   : > { %v3047_v15 = vpop.eup %2418  ;;  %v1190_v13 = vmul.f32 %v2417_v8, %v1164_v5  ;;  %v1779_v51 = vsel %vm1777_vm14, %v1776_v11, %v2978_v1  ;;  %v1167_v17 = vpop.xlane.xlu2 %1166  ;;  %vm1195_vm1 = vweird.f32 %v2417_v8 }
 0x5b1   : > { %v1782_v18 = vsel %vm1780_vm15, %v1779_v51, %v3030_v60  ;;  %2420 = vrcp.f32 %v1167_v17  ;;  %1092 = vperm.xlu0 %2372, %v3047_v15   ;;  %vm1196_vm5 = vmor %vm1194_vm4, %vm1195_vm1  ;;  %v1215_v23 = vand.u32 2147483648, %v1167_v17  ;;  %vm1209_vm8 = vweird.f32 %v1167_v17 }
 0x5b2   : > { %v1191_v19 = vsub.f32 1.0, %v1190_v13  ;;  %1785 = vst.msk [vmem:[#allocation5 + $0x8] sm:$0xff] %vm1783_vm0, %v1782_v18  ;;  %v1213_v55 = vand.u32 2147483647, %v1167_v17 }
 0x5b3   : > { %v1216_v59 = vor.u32 1.1754944e-38, %v1215_v23 }
 0x5b4   : > { %v1192_v28 = vmul.f32 %v2417_v8, %v1191_v19  ;;  %vm1214_vm11 = vcmp.eq.f32.partialorder %v1213_v55, 8.507059e+37 }
 0x5b6   : > { %v1193_v33 = vadd.f32 %v2417_v8, %v1192_v28  ;;  %v1453_v28 = vsub.f32 %v2942_v20, %v3013_v27 }
 0x5b7   : > { %v2421_v12 = vpop.eup %2420  ;;  %2368 = vset.pattern.permute.xlu1 %v2573_v31 }
 0x5b8   : > { %v1205_v32 = vmul.f32 %v2421_v12, %v1167_v17  ;;  %1461 = vperm.xlu1 %2368, %v3013_v27   ;;  %v1197_v42 = vsel %vm1196_vm5, %v2417_v8, %v1193_v33  ;;  %vm1210_vm6 = vweird.f32 %v2421_v12  ;;  %v1455_v37 = vmul.f32 1.442695, %v1453_v28  ;;  %v3072_v44 = vpop.permute.xlu2 %1466 }
 0x5b9   : > { %2375 = vset.pattern.permute.xlu0 %v2573_v31  ;;  %v1202_v56 = vsel %vm1199_vm7, %v1201_v26, %v1197_v42  ;;  %vm1211_vm9 = vmor %vm1209_vm8, %vm1210_vm6  ;;  %v1470_v46 = vsub.f32 %v2210_v0, %v3072_v44 }
 0x5ba   : > { %v1206_v34 = vsub.f32 1.0, %v1205_v32 }
 0x5bb   : > { %v1184_v41 = vpop.f32.mrf.mxu1 }
 0x5bc   : > { %v1207_v43 = vmul.f32 %v2421_v12, %v1206_v34  ;;  %v1219_v57 = vmul.f32 %v1202_v56, %v1184_v41 }
 0x5be   : > { %v1208_v24 = vadd.f32 %v2421_v12, %v1207_v43  ;;  %v1221_v5 = vpack.c.bf16 %v1219_v57, %v1219_v57 }
 0x5bf   : > { %v1295_v35 = vpop.permute.xlu0 %1294 }
 0x5c0   : > { %1307 = vmatpush.bf16.msra.mxu2 %v1295_v35  ;;  %v1212_v31 = vsel %vm1211_vm9, %v2421_v12, %v1208_v24  ;;  %2374 = vset.pattern.permute.xlu1 %v2572_v39  ;;  %v1258_v8 = vpop.permute.xlu1 %1257  ;;  %v1739_v13 = vunpack.c.l.b16 %v1221_v5  ;;  %v1369_v12 = vsel %vm950_vm3, %v2983_v52, 0.0  ;;  %v1657_v52 = vsub.f32 %v2942_v20, %v3019_v7 }
 0x5c1   : > { %v1217_v4 = vsel %vm1214_vm11, %v1216_v59, %v1212_v31  ;;  %v1265_v17 = vsub.f32 %v2201_v38, %v1258_v8  ;;  %v1454_v38 = vsub.f32 %v2924_v10, %v2978_v1 }
 0x5c2   : > { %v1659_v23 = vmul.f32 1.442695, %v1657_v52 }
 0x5c3   : > { %v1186_v2 = vpop.f32.mrf.mxu1  ;;  %v1267_v19 = vmul.f32 1.442695, %v1265_v17  ;;  %v1457_v34 = vmul.f32 1.442695, %v1454_v38 }
 0x5c4   : > { %1511 = vmatpush.bf16.msrb.mxu2 %v1499_v61  ;;  %v1220_v22 = vmul.f32 %v1217_v4, %v1186_v2 }
 0x5c5   : > { %2422 = vpow2.f32 %v1267_v19 }
 0x5c6   : > { %v1222_v11 = vpack.c.bf16 %v1220_v22, %v1220_v22  ;;  %2424 = vpow2.f32 %v1455_v37 }
 0x5c8   : > { %v1740_v51 = vunpack.c.l.b16 %v1222_v11 }
 0x5ca   : > { %v1741_v18 = vpack.c.b16 %v1740_v51, %v1739_v13 }
 0x5cb   : > { %v3062_v39 = vpop.eup %2422 }
 0x5cc   : > { %1742 = vrot.lane.b32.xlu2 %v1741_v18, %s2576_s15  ;;  %v1273_v61 = vsel %vm950_vm3, %v3062_v39, 0.0  ;;  %v3074_v36 = vpop.eup %2424 }
 0x5db   : > { %1274 = vadd.xlane.f32.xlu0 %v1273_v61 }
 0x5e2   : > { %1370 = vadd.xlane.f32.xlu1 %v1369_v12 }
 0x5e9   : > { %v1388_v32 = vpop.f32.mrf.mxu1 }
 0x5ea   : > { %v1368_v33 = vpop.xlane.xlu0 %1367 }
 0x5eb   : > { %2426 = vrcp.f32 %v1368_v33  ;;  %v1404_v24 = vand.u32 2147483648, %v1368_v33  ;;  %v1402_v35 = vand.u32 2147483647, %v1368_v33  ;;  %vm1398_vm1 = vweird.f32 %v1368_v33 }
 0x5ec   : > { %2428 = vpow2.f32 %v1457_v34 }
 0x5ed   : > { %v1405_v31 = vor.u32 1.1754944e-38, %v1404_v24  ;;  %vm1403_vm5 = vcmp.eq.f32.partialorder %v1402_v35, 8.507059e+37 }
 0x5ef   : > { %1487 = vperm.xlu0 %2375, %v3074_v36  }
 0x5f1   : > { %v2427_v27 = vpop.eup %2426  ;;  %v3079_v41 = vpop.f32.mrf.mxu1 }
 0x5f2   : > { %v1394_v42 = vmul.f32 %v2427_v27, %v1368_v33  ;;  %v1575_v43 = vpop.xlane.xlu0 %1574  ;;  %v3081_v55 = vpop.eup %2428  ;;  %vm1399_vm12 = vweird.f32 %v2427_v27 }
 0x5f3   : > { %2430 = vrcp.f32 %v1575_v43  ;;  %v1572_v1 = vpop.xlane.xlu2 %1571  ;;  %vm1400_vm4 = vmor %vm1398_vm1, %vm1399_vm12  ;;  %v1623_v17 = vand.u32 2147483648, %v1575_v43  ;;  %v1621_v61 = vand.u32 2147483647, %v1575_v43  ;;  %vm1617_vm8 = vweird.f32 %v1575_v43 }
 0x5f4   : > { %v1395_v26 = vsub.f32 1.0, %v1394_v42  ;;  %2432 = vrcp.f32 %v1572_v1  ;;  %v1608_v18 = vand.u32 2147483648, %v1572_v1  ;;  %v1606_v37 = vand.u32 2147483647, %v1572_v1 }
 0x5f5   : > { %2434 = vpow2.f32 %v1659_v23  ;;  %vm1602_vm9 = vweird.f32 %v1572_v1  ;;  %vm1622_vm1 = vcmp.eq.f32.partialorder %v1621_v61, 8.507059e+37 }
 0x5f6   : > { %v1396_v56 = vmul.f32 %v2427_v27, %v1395_v26  ;;  %v1609_v33 = vor.u32 1.1754944e-38, %v1608_v18 }
 0x5f7   : > { %1492 = vperm.xlu0 %2375, %v3081_v55  }
 0x5f8   : > { %v1397_v57 = vadd.f32 %v2427_v27, %v1396_v56 }
 0x5f9   : > { %v2431_v7 = vpop.eup %2430  ;;  %v1592_v59 = vpop.f32.mrf.mxu1 }
 0x5fa   : > { %v2433_v2 = vpop.eup %2432  ;;  %v1613_v4 = vmul.f32 %v2431_v7, %v1575_v43  ;;  %v1401_v5 = vsel %vm1400_vm4, %v2427_v27, %v1397_v57  ;;  %vm1618_vm6 = vweird.f32 %v2431_v7  ;;  %vm1607_vm4 = vcmp.eq.f32.partialorder %v1606_v37, 8.507059e+37 }
 0x5fb   : > { %v1598_v22 = vmul.f32 %v2433_v2, %v1572_v1  ;;  %1702 = vrot.lane.b32.xlu1 %v2832_v62, %s2577_s2  ;;  %v1406_v8 = vsel %vm1403_vm5, %v1405_v31, %v1401_v5  ;;  %v3087_v28 = vpop.eup %2434  ;;  %vm1603_vm7 = vweird.f32 %v2433_v2  ;;  %vm1619_vm11 = vmor %vm1617_vm8, %vm1618_vm6 }
 0x5fc   : > { %v1614_v11 = vsub.f32 1.0, %v1613_v4  ;;  %v3085_v13 = vmul.f32 %v1406_v8, %v1388_v32  ;;  %v1624_v32 = vor.u32 1.1754944e-38, %v1623_v17  ;;  %vm1604_vm12 = vmor %vm1602_vm9, %vm1603_vm7  ;;  %v3092_v4 = vld [vmem:[#allocation7] sm:$0xff]  ;;  %vm1763_vm9 = vcmask 195584  }
 0x5fd   : > { %v1599_v51 = vsub.f32 1.0, %v1598_v22 }
 0x5fe   : > { %v1615_v19 = vmul.f32 %v2431_v7, %v1614_v11  ;;  %v1425_v14 = vpack.c.bf16 %v3085_v13, %v3085_v13  ;;  %v1658_v13 = vsub.f32 %v2924_v10, %v3030_v60 }
 0x5ff   : > { %v1600_v12 = vmul.f32 %v2433_v2, %v1599_v51  ;;  %2376 = vset.pattern.permute.xlu0 %v2575_v21  ;;  %v1077_v51 = vsel %vm950_vm3, %v3007_v50, 0.0  ;;  %v1080_v50 = vsel %vm950_vm3, %v3005_v45, 0.0 }
 0x600   : > { %v1616_v38 = vadd.f32 %v2431_v7, %v1615_v19  ;;  %1691 = vperm.xlu0 %2376, %v3087_v28  }
 0x601   : > { %v1601_v62 = vadd.f32 %v2433_v2, %v1600_v12  ;;  %v1594_v52 = vpop.f32.mrf.mxu1  ;;  %v1473_v12 = vmul.f32 1.442695, %v1470_v46 }
 0x602   : > { %v1620_v34 = vsel %vm1619_vm11, %v2431_v7, %v1616_v38  ;;  %v1666_v38 = vpop.permute.xlu2 %1665 }
 0x603   : > { %v1605_v27 = vsel %vm1604_vm12, %v2433_v2, %v1601_v62  ;;  %v1625_v42 = vsel %vm1622_vm1, %v1624_v32, %v1620_v34 }
 0x604   : > { %v1610_v26 = vsel %vm1607_vm4, %v1609_v33, %v1605_v27  ;;  %v1628_v23 = vmul.f32 %v1625_v42, %v1594_v52 }
 0x605   : > { %v1627_v24 = vmul.f32 %v1610_v26, %v1592_v59 }
 0x606   : > { %v1630_v56 = vpack.c.bf16 %v1628_v23, %v1628_v23 }
 0x607   : > { %v1629_v35 = vpack.c.bf16 %v1627_v24, %v1627_v24 }
 0x608   : > { %v1754_v57 = vunpack.c.l.b16 %v1630_v56 }
 0x609   : > { %v1753_v43 = vunpack.c.l.b16 %v1629_v35 }
 0x60b   : > { %v1755_v31 = vpack.c.b16 %v1754_v57, %v1753_v43 }
 0x60d   : > { %1756 = vrot.lane.b32.xlu2 %v1755_v31, %s2578_s23 }
 0x612   : > { %v1671_v1 = vpop.permute.xlu0 %1670  ;;  %v1113_v5 = vpop.f32.mrf.mxu2 }
 0x613   : > { %v1674_v32 = vsub.f32 %v2218_v30, %v1671_v1  ;;  %v1746_v30 = vunpack.c.l.b16 %v1425_v14 }
 0x615   : > { %v1677_v52 = vmul.f32 1.442695, %v1674_v32 }
 0x61b   : > { %v1088_v7 = vpop.permute.xlu0 %1087 }
 0x61c   : > { %v1095_v2 = vmul.f32 %v1088_v7, %v3092_v4  ;;  %v1661_v7 = vmul.f32 1.442695, %v1658_v13  ;;  %v2383_v13 = vld [vmem:[%s3346_s28] ss:$0 sm:$0xff] }
 0x61e   : > { %v3095_v22 = vadd.f32 %v1113_v5, %v1095_v2 }
 0x621   : > { %v1263_v8 = vpop.permute.xlu1 %1262 }
 0x622   : > { %v1266_v59 = vsub.f32 %v2202_v47, %v1263_v8  ;;  %v1250_v8 = vsub.f32 %v2924_v10, %v3041_v6  ;;  %v2255_v10 = vld [vmem:[%s3344_s21] sm:$0xff] }
 0x623   : > { %v3164_v16 = vpop.permute.xlu0 %1092 }
 0x624   : > { %v1269_v11 = vmul.f32 1.442695, %v1266_v59  ;;  %v1253_v59 = vmul.f32 1.442695, %v1250_v8 }
 0x625   : > { %1078 = vadd.xlane.f32.xlu1 %v1077_v51 }
 0x626   : > { %2436 = vpow2.f32 %v1269_v11  ;;  %v3139_v11 = vpop.f32.mrf.mxu2  ;;  %v1743_v46 = vpop.permute.xlu2 %1742 }
 0x62a   : > { %v1462_v17 = vpop.permute.xlu1 %1461 }
 0x62b   : > { %v1469_v19 = vsub.f32 %v2209_v54, %v1462_v17 }
 0x62c   : > { %v3101_v18 = vpop.eup %2436 }
 0x62d   : > { %v1293_v61 = vpack.c.bf16 %v3101_v18, %v3062_v39  ;;  %v1471_v47 = vmul.f32 1.442695, %v1469_v19  ;;  %v1249_v39 = vsub.f32 %v2942_v20, %v2973_v58  ;;  %v1673_v20 = vsub.f32 %v2217_v25, %v1666_v38 }
 0x62e   : > { %v1276_v5 = vsel %vm950_vm3, %v3101_v18, 0.0  ;;  %v2256_v18 = vld [vmem:[%s3344_s21 + $0x8] sm:$0xff] }
 0x62f   : > { %2203 = vmatmul.msk.bf16.vlgmr.msra.gmra.mxu2 %vm950_vm3, %v1293_v61  ;;  %2438 = vpow2.f32 %v1471_v47  ;;  %v1251_v63 = vmul.f32 1.442695, %v1249_v39  ;;  %v1675_v26 = vmul.f32 1.442695, %v1673_v20  ;;  %1822 = vmatpush.bf16.msra.mxu0 %v2256_v18 }
 0x630   : > { %2440 = vpow2.f32 %v1473_v12 }
 0x631   : > { %2442 = vpow2.f32 %v1251_v63 }
 0x633   : > { %1823 = vmatpush.bf16.msra.mxu0 %v2255_v10 }
 0x635   : > { %v2439_v37 = vpop.eup %2438 }
 0x636   : > { %1081 = vadd.xlane.f32.xlu2 %v1080_v50  ;;  %v3113_v53 = vpop.eup %2440  ;;  %v1760_v50 = vsel %vm920_vm2, %v1736_v9, %v1743_v46 }
 0x637   : > { %v1497_v54 = vpack.c.bf16 %v3113_v53, %v2439_v37  ;;  %v3119_v0 = vpop.eup %2442  ;;  %v1480_v47 = vsel %vm950_vm3, %v3113_v53, 0.0 }
 0x63f   : > { %2211 = vmatmul.msk.bf16.vlgmr.msrb.gmra.mxu2 %vm950_vm3, %v1497_v54 }
 0x64e   : > { %1283 = vperm.xlu2 %2373, %v3119_v0   ;;  %v1275_v38 = vpop.xlane.xlu0 %1274 }
 0x655   : > { %v1371_v44 = vpop.xlane.xlu1 %1370 }
 0x656   : > { %2444 = vrcp.f32 %v1371_v44  ;;  %2377 = vset.pattern.permute.xlu2 %v2575_v21  ;;  %v1419_v58 = vand.u32 2147483648, %v1371_v44  ;;  %v1417_v27 = vand.u32 2147483647, %v1371_v44  ;;  %vm1413_vm6 = vweird.f32 %v1371_v44 }
 0x657   : > { %2446 = vpow2.f32 %v1677_v52  ;;  %v907_v52 = vld [vmem:[#allocation6 + $0x8] sm:$0xff] }
 0x658   : > { %v1420_v21 = vor.u32 1.1754944e-38, %v1419_v58  ;;  %vm1418_vm8 = vcmp.eq.f32.partialorder %v1417_v27, 8.507059e+37  ;;  %2448 = vpow2.f32 %v1675_v26  ;;  %v1076_v26 = vmul.f32 %v3047_v15, %v907_v52  ;;  %v2382_v15 = vld [vmem:[%s3345_s16] ss:$0 sm:$0xff] }
 0x659   : > { %2450 = vpow2.f32 %v1661_v7 }
 0x65a   : > { %2452 = vpow2.f32 %v1253_v59 }
 0x65c   : > { %v2445_v45 = vpop.eup %2444 }
 0x65d   : > { %v1409_v62 = vmul.f32 %v2445_v45, %v1371_v44  ;;  %vm1414_vm5 = vweird.f32 %v2445_v45  ;;  %v2447_v35 = vpop.eup %2446 }
 0x65e   : > { %vm1415_vm7 = vmor %vm1413_vm6, %vm1414_vm5  ;;  %v2449_v31 = vpop.eup %2448  ;;  %v1684_v12 = vsel %vm950_vm3, %v2447_v35, 0.0 }
 0x65f   : > { %v1410_v33 = vsub.f32 1.0, %v1409_v62  ;;  %v1701_v1 = vpack.c.bf16 %v2447_v35, %v2449_v31  ;;  %v2451_v2 = vpop.eup %2450  ;;  %v1681_v53 = vsel %vm950_vm3, %v2449_v31, 0.0 }
 0x660   : > { %v2453_v51 = vpop.eup %2452 }
 0x661   : > { %v1411_v34 = vmul.f32 %v2445_v45, %v1410_v33  ;;  %v1488_v32 = vpop.permute.xlu0 %1487 }
 0x663   : > { %v1412_v42 = vadd.f32 %v2445_v45, %v1411_v34 }
 0x665   : > { %v1416_v23 = vsel %vm1415_vm7, %v2445_v45, %v1412_v42  ;;  %v1272_v42 = vmul.f32 %v2453_v51, %v907_v52 }
 0x666   : > { %v1421_v24 = vsel %vm1418_vm8, %v1420_v21, %v1416_v23  ;;  %v1476_v23 = vmul.f32 %v3081_v55, %v907_v52  ;;  %v906_v55 = vld [vmem:[#allocation6] sm:$0xff] }
 0x667   : > { %v1424_v29 = vmul.f32 %v1421_v24, %v3079_v41  ;;  %v1477_v41 = vsel %vm950_vm3, %v2439_v37, 0.0  ;;  %v1757_v54 = vpop.permute.xlu2 %1756  ;;  %v1680_v24 = vmul.f32 %v2451_v2, %v907_v52  ;;  %v1475_v8 = vmul.f32 %v3074_v36, %v906_v55 }
 0x669   : > { %v1426_v25 = vpack.c.bf16 %v1424_v29, %v1424_v29  ;;  %v1493_v58 = vpop.permute.xlu0 %1492 }
 0x66b   : > { %v1747_v56 = vunpack.c.l.b16 %v1426_v25 }
 0x66d   : > { %v1703_v43 = vpop.permute.xlu1 %1702  ;;  %v1748_v57 = vpack.c.b16 %v1747_v56, %v1746_v30 }
 0x66e   : > { %1715 = vmatpush.bf16.msra.mxu2 %v1703_v43 }
 0x66f   : > { %1749 = vrot.lane.b32.xlu1 %v1748_v57, %s2579_s24 }
 0x671   : > { %2219 = vmatmul.msk.bf16.vlgmr.msra.gmra.mxu2 %vm950_vm3, %v1701_v1 }
 0x672   : > { %v1692_v30 = vpop.permute.xlu0 %1691 }
 0x677   : > { %1478 = vadd.xlane.f32.xlu2 %v1477_v41 }
 0x68f   : > { %1696 = vperm.xlu2 %2377, %v2451_v2  }
 0x698   : > { %v1079_v61 = vpop.xlane.xlu1 %1078 }
 0x699   : > { %1277 = vadd.xlane.f32.xlu1 %v1276_v5  ;;  %v1075_v5 = vmul.f32 %v3036_v40, %v906_v55 }
 0x6a9   : > { %v1082_v3 = vpop.xlane.xlu2 %1081 }
 0x6aa   : > { %v1084_v29 = vadd.f32 %v1082_v3, %v1076_v26 }
 0x6b1   : > { %v1284_v9 = vpop.permute.xlu2 %1283 }
 0x6b2   : > { %v1309_v17 = vpop.f32.mrf.mxu2  ;;  %1288 = vperm.xlu1 %2374, %v2453_v51   ;;  %v1271_v51 = vmul.f32 %v3119_v0, %v906_v55  ;;  %v1291_v36 = vmul.f32 %v1284_v9, %v3092_v4 }
 0x6b3   : > { %1316 = vrot.lane.b32.xlu2 %v1309_v17, %s2576_s15  ;;  %v1083_v17 = vadd.f32 %v1079_v61, %v1075_v5 }
 0x6b4   : > { %v1279_v10 = vadd.f32 %v1275_v38, %v1271_v51 }
 0x6ba   : > { %v1311_v60 = vpop.f32.mrf.mxu2 }
 0x6bb   : > { %1318 = vrot.lane.b32.xlu0 %v1311_v60, %s2576_s15 }
 0x6c2   : > { %v1513_v6 = vpop.f32.mrf.mxu2 }
 0x6ca   : > { %v1515_v19 = vpop.f32.mrf.mxu2 }
 0x6cb   : > { %1522 = vrot.lane.b32.xlu0 %v1515_v19, %s2579_s24  ;;  %v1679_v19 = vmul.f32 %v3087_v28, %v906_v55 }
 0x6dc   : > { %1481 = vadd.xlane.f32.xlu1 %v1480_v47  ;;  %1685 = vadd.xlane.f32.xlu2 %v1684_v12  ;;  %v1786_v47 = vsel %vm1774_vm13, %v1083_v17, %v1279_v10 }
 0x6e1   : > { %v1750_v37 = vpop.permute.xlu1 %1749 }
 0x6e2   : > { %v1762_v39 = vsel %vm950_vm3, %v1760_v50, %v1750_v37  ;;  %v1495_v50 = vmul.f32 %v1488_v32, %v3092_v4 }
 0x6e3   : > { %v1765_v63 = vsel %vm1763_vm9, %v1762_v39, %v1757_v54  ;;  %v1699_v39 = vmul.f32 %v1692_v30, %v3092_v4 }
 0x6e4   : > { %2228 = vmatmul.msk.bf16.vlgmr.msra.gmra.mxu0 %vm797_vm10, %v1765_v63 }
 0x6ea   : > { %v1479_v62 = vpop.xlane.xlu2 %1478 }
 0x6eb   : > { %v1483_v60 = vadd.f32 %v1479_v62, %v1475_v8 }
 0x6ed   : > { %v1788_v0 = vsel %vm1777_vm14, %v1786_v47, %v1483_v60 }
 0x6f2   : > { %v3166_v33 = vpop.permute.xlu2 %1696 }
 0x6f4   : > { %v1717_v44 = vpop.f32.mrf.mxu2 }
 0x6f5   : > { %1682 = vadd.xlane.f32.xlu0 %v1681_v53  ;;  %1520 = vrot.lane.b32.xlu1 %v1513_v6, %s2579_s24  ;;  %v909_v53 = vld [vmem:[#allocation7 + $0x8] sm:$0xff] }
 0x6f6   : > { %v1096_v38 = vmul.f32 %v3164_v16, %v909_v53  ;;  %v1700_v52 = vmul.f32 %v3166_v33, %v909_v53 }
 0x6fc   : > { %v1719_v45 = vpop.f32.mrf.mxu2 }
 0x6fd   : > { %1724 = vrot.lane.b32.xlu1 %v1717_v44, %s2578_s23 }
 0x705   : > { %1726 = vrot.lane.b32.xlu1 %v1719_v45, %s2578_s23  ;;  %s3349_s23 = sld [smem:[#allocation31_spill]] (!%p2229_p1) }
 0x70c   : > { %v1278_v20 = vpop.xlane.xlu1 %1277 }
 0x70d   : > { %v1317_v34 = vpop.permute.xlu2 %1316  ;;  %v1280_v21 = vadd.f32 %v1278_v20, %v1272_v42  ;;  %v1496_v20 = vmul.f32 %v1493_v58, %v909_v53 }
 0x70e   : > { %v1322_v37 = vadd.f32 %v1317_v34, %v1291_v36  ;;  %v1119_v34 = vadd.f32 %v3139_v11, %v1096_v38 }
 0x70f   : > { %v1787_v43 = vsel %vm1774_vm13, %v1084_v29, %v1280_v21 }
 0x710   : > { %v1766_v45 = vsel %vm920_vm2, %v3095_v22, %v1322_v37 }
 0x724   : > { %v1289_v27 = vpop.permute.xlu1 %1288 }
 0x725   : > { %v1292_v62 = vmul.f32 %v1289_v27, %v909_v53 }
 0x72d   : > { %v1319_v1 = vpop.permute.xlu0 %1318 }
 0x72e   : > { %v1323_v4 = vadd.f32 %v1319_v1, %v1292_v62 }
 0x730   : > { %v1767_v42 = vsel %vm920_vm2, %v1119_v34, %v1323_v4 }
 0x73d   : > { %v1523_v41 = vpop.permute.xlu0 %1522 }
 0x74f   : > { %v1482_v14 = vpop.xlane.xlu1 %1481  ;;  %v1686_v25 = vpop.xlane.xlu2 %1685 }
 0x750   : > { %v1484_v56 = vadd.f32 %v1482_v14, %v1476_v23  ;;  %v1688_v35 = vadd.f32 %v1686_v25, %v1680_v24 }
 0x752   : > { %v1789_v57 = vsel %vm1777_vm14, %v1787_v43, %v1484_v56 }
 0x753   : > { %v1791_v31 = vsel %vm1780_vm15, %v1789_v57, %v1688_v35 }
 0x754   : > { %1793 = vst.msk [vmem:[#allocation6 + $0x8] sm:$0xff] %vm1783_vm0, %v1791_v31 }
 0x761   : > { %v1825_v7 = vpop.f32.mrf.mxu0 }
 0x762   : > { %v1826_v2 = vadd.f32 %v2382_v15, %v1825_v7 }
 0x764   : > { %v1834_v59 = vmul.f32 %v2383_v13, %v1826_v2 }
 0x766   : > { %v1836_v18 = vadd.f32 %v1834_v59, %v2821_v48 }
 0x767   : > { %v1521_v6 = vpop.permute.xlu1 %1520 }
 0x768   : > { %1838 = vst.msk [vmem:[%s2774_s8] sm:$0xff] %vm797_vm10, %v1836_v18  ;;  %v1683_v46 = vpop.xlane.xlu0 %1682  ;;  %v1526_v54 = vadd.f32 %v1521_v6, %v1495_v50 }
 0x769   : > { %v1687_v12 = vadd.f32 %v1683_v46, %v1679_v19  ;;  %v1827_v40 = vpop.f32.mrf.mxu0 }
 0x76a   : > { %v1828_v61 = vadd.f32 %v2382_v15, %v1827_v40  ;;  %v1768_v9 = vsel %vm950_vm3, %v1766_v45, %v1526_v54 }
 0x76b   : > { %v1790_v48 = vsel %vm1780_vm15, %v1788_v0, %v1687_v12 }
 0x76c   : > { %1792 = vst.msk [vmem:[#allocation6] sm:$0xff] %vm1783_vm0, %v1790_v48  ;;  %v1835_v28 = vmul.f32 %v2383_v13, %v1828_v61 }
 0x76e   : > { %v1837_v63 = vadd.f32 %v1835_v28, %v2823_v49  ;;  %v1527_v49 = vadd.f32 %v1523_v41, %v1496_v20 }
 0x76f   : > { %v1725_v44 = vpop.permute.xlu1 %1724 }
 0x770   : > { %1839 = vst.msk [vmem:[%s2774_s8 + $0x8] sm:$0xff] %vm797_vm10, %v1837_v63  ;;  %v1730_v3 = vadd.f32 %v1725_v44, %v1699_v39  ;;  %v1769_v21 = vsel %vm950_vm3, %v1767_v42, %v1527_v49 }
 0x772   : > { %v1770_v32 = vsel %vm1763_vm9, %v1768_v9, %v1730_v3 }
 0x773   : > { %1772 = vst.msk [vmem:[#allocation7] sm:$0xff] %vm797_vm10, %v1770_v32 }
 0x777   : > { %v1727_v22 = vpop.permute.xlu1 %1726  ;;  %1843 = sbr.rel (%p2229_p1) target bundleno = 2221 (0x8ad), region = 96 }
 0x778   : > { %v1731_v26 = vadd.f32 %v1727_v22, %v1700_v52 }
 0x77a   : > { %v1771_v16 = vsel %vm1763_vm9, %v1769_v21, %v1731_v26 }
 0x77b   : > { %1773 = vst.msk [vmem:[#allocation7 + $0x8] sm:$0xff] %vm797_vm10, %v1771_v16 }
 0x77c   : > { %v1844_v58 = vld [vmem:[#allocation6] sm:$0xff]  ;;  %v1845_v27 = vld [vmem:[#allocation6 + $0x8] sm:$0xff]  ;;  %v2580_v23 = vmov 1   ;;  %v2581_v11 = vmov 0   ;;  %v2582_v33 = vmov 2   ;;  %v2583_v51 = vmov 3  }
 0x77d   : > { %2455 = vset.pattern.permute.xlu1 %v2580_v23  ;;  %2454 = vset.pattern.permute.xlu0 %v2581_v11  ;;  %2461 = vrcp.f32 %v1844_v58  ;;  %v1857_v25 = vand.u32 2147483648, %v1844_v58  ;;  %vm1851_vm13 = vweird.f32 %v1844_v58  ;;  %v1855_v35 = vand.u32 2147483647, %v1844_v58  ;;  %v2259_v17 = vld [vmem:[%s3347_s29 + $0x8] sm:$0xff]  ;;  %v2258_v60 = vld [vmem:[%s3348_s22] sm:$0xff] }
 0x77e   : > { %2463 = vrcp.f32 %v1845_v27  ;;  %2456 = vset.pattern.permute.xlu2 %v2582_v33  ;;  %vm1866_vm11 = vweird.f32 %v1845_v27  ;;  %v1872_v55 = vand.u32 2147483648, %v1845_v27  ;;  %v1870_v7 = vand.u32 2147483647, %v1845_v27  ;;  %1961 = vmatpush.bf16.msra.mxu0 %v2259_v17  ;;  %v1910_v0 = vld [vmem:[#allocation7] sm:$0xff]  ;;  %v1970_v52 = vld [vmem:[#allocation2 + $0x8] sm:$0xff] }
 0x77f   : > { %v1858_v31 = vor.u32 1.1754944e-38, %v1857_v25  ;;  %vm1856_vm0 = vcmp.eq.f32.partialorder %v1855_v35, 8.507059e+37  ;;  %vm1922_vm5 = vcmask 257024   ;;  %v2459_v3 = vld [vmem:[%s3349_s23] ss:$0 sm:$0xff] }
 0x780   : > { %v1873_v5 = vor.u32 1.1754944e-38, %v1872_v55  ;;  %vm1871_vm4 = vcmp.eq.f32.partialorder %v1870_v7, 8.507059e+37  ;;  %v2460_v9 = vld [vmem:[%s3350_s26] ss:$0 sm:$0xff] }
 0x781   : > { %v1969_v32 = vld [vmem:[#allocation2] sm:$0xff] }
 0x782   : > { %1962 = vmatpush.bf16.msra.mxu0 %v2258_v60  ;;  %v1911_v36 = vld [vmem:[#allocation7 + $0x8] sm:$0xff] }
 0x783   : > { %v2462_v24 = vpop.eup %2461 }
 0x784   : > { %v2464_v29 = vpop.eup %2463  ;;  %v1847_v14 = vmul.f32 %v2462_v24, %v1844_v58  ;;  %vm1852_vm14 = vweird.f32 %v2462_v24 }
 0x785   : > { %v1862_v30 = vmul.f32 %v2464_v29, %v1845_v27  ;;  %vm1853_vm15 = vmor %vm1851_vm13, %vm1852_vm14  ;;  %vm1867_vm12 = vweird.f32 %v2464_v29 }
 0x786   : > { %v1848_v56 = vsub.f32 1.0, %v1847_v14  ;;  %vm1868_vm1 = vmor %vm1866_vm11, %vm1867_vm12 }
 0x787   : > { %v1863_v43 = vsub.f32 1.0, %v1862_v30 }
 0x788   : > { %v1849_v57 = vmul.f32 %v2462_v24, %v1848_v56 }
 0x789   : > { %v1864_v1 = vmul.f32 %v2464_v29, %v1863_v43 }
 0x78a   : > { %v1850_v15 = vadd.f32 %v2462_v24, %v1849_v57 }
 0x78b   : > { %v1865_v13 = vadd.f32 %v2464_v29, %v1864_v1 }
 0x78c   : > { %v1854_v41 = vsel %vm1853_vm15, %v2462_v24, %v1850_v15 }
 0x78d   : > { %v1859_v2 = vsel %vm1856_vm0, %v1858_v31, %v1854_v41  ;;  %v1869_v8 = vsel %vm1868_vm1, %v2464_v29, %v1865_v13 }
 0x78e   : > { %1887 = vperm.xlu1 %2455, %v1859_v2   ;;  %1878 = vperm.xlu0 %2454, %v1859_v2   ;;  %v1874_v59 = vsel %vm1871_vm4, %v1873_v5, %v1869_v8 }
 0x78f   : > { %1895 = vperm.xlu2 %2456, %v1859_v2  }
 0x796   : > { %1891 = vperm.xlu1 %2455, %v1874_v59   ;;  %1883 = vperm.xlu0 %2454, %v1874_v59  }
 0x797   : > { %1899 = vperm.xlu2 %2456, %v1874_v59  }
 0x79e   : > { %2458 = vset.pattern.permute.xlu1 %v2583_v51  ;;  %2457 = vset.pattern.permute.xlu0 %v2583_v51 }
 0x79f   : > { %1907 = vperm.xlu1 %2458, %v1874_v59   ;;  %1903 = vperm.xlu0 %2457, %v1859_v2  }
 0x7e9   : > { %v1896_v6 = vpop.permute.xlu2 %1895 }
 0x7f1   : > { %v1900_v12 = vpop.permute.xlu2 %1899 }
 0x800   : > { %v1888_v18 = vpop.permute.xlu1 %1887  ;;  %v1879_v10 = vpop.permute.xlu0 %1878 }
 0x801   : > { %v1912_v47 = vsel %vm920_vm2, %v1879_v10, %v1888_v18 }
 0x802   : > { %v1914_v48 = vsel %vm950_vm3, %v1912_v47, %v1896_v6 }
 0x808   : > { %v1892_v19 = vpop.permute.xlu1 %1891  ;;  %v1884_v46 = vpop.permute.xlu0 %1883 }
 0x809   : > { %v1913_v40 = vsel %vm920_vm2, %v1884_v46, %v1892_v19 }
 0x80a   : > { %v1915_v50 = vsel %vm950_vm3, %v1913_v40, %v1900_v12 }
 0x811   : > { %v1908_v61 = vpop.permute.xlu1 %1907  ;;  %v1904_v37 = vpop.permute.xlu0 %1903 }
 0x812   : > { %v1917_v28 = vsel %vm1763_vm9, %v1915_v50, %v1908_v61  ;;  %v1916_v54 = vsel %vm1763_vm9, %v1914_v48, %v1904_v37 }
 0x813   : > { %v1919_v39 = vmul.f32 %v1917_v28, %v1911_v36  ;;  %v1918_v63 = vmul.f32 %v1916_v54, %v1910_v0 }
 0x815   : > { %v1921_v53 = vpack.c.bf16 %v1919_v39, %v1919_v39  ;;  %v1920_v44 = vpack.c.bf16 %v1918_v63, %v1918_v63 }
 0x817   : > { %1924 = vst.msk [vmem:[#allocation3 + $0x4] sm:$0xf] %vm1922_vm5, %v1921_v53 }
 0x818   : > { %1923 = vst.msk [vmem:[#allocation3] sm:$0xf] %vm1922_vm5, %v1920_v44 }
 0x81f   : > { %v2257_v45 = vld [vmem:[#allocation3] sm:$0xff] }
 0x820   : > { %2242 = vmatmul.msk.bf16.vlgmr.msra.gmra.mxu0 %vm797_vm10, %v2257_v45 }
 0x89d   : > { %v1964_v38 = vpop.f32.mrf.mxu0 }
 0x89e   : > { %v1965_v62 = vadd.f32 %v2459_v3, %v1964_v38 }
 0x8a0   : > { %v1975_v20 = vmul.f32 %v2460_v9, %v1965_v62 }
 0x8a2   : > { %v1977_v4 = vadd.f32 %v1975_v20, %v1969_v32 }
 0x8a4   : > { %1979 = vst.msk [vmem:[%s2776_s19] sm:$0xff] %vm797_vm10, %v1977_v4 }
 0x8a5   : > { %v1966_v49 = vpop.f32.mrf.mxu0 }
 0x8a6   : > { %v1967_v34 = vadd.f32 %v2459_v3, %v1966_v49 }
 0x8a8   : > { %v1976_v22 = vmul.f32 %v2460_v9, %v1967_v34 }
 0x8aa   : > { %v1978_v42 = vadd.f32 %v1976_v22, %v1970_v52 }
 0x8ac   : > { %1980 = vst.msk [vmem:[%s2776_s19 + $0x8] sm:$0xff] %vm797_vm10, %v1978_v42 }
 0x8ad PF: > { %s3351_s11 = sld [smem:[#allocation15_spill]]  ;;  %s2007_s30 = sshll.u32 %s2776_s19, 4  ;;  %s2008_s30 = int_to_ptr.vmem [resolvable:$true] %s2007_s30 }
 0x8ae   : > { %s3352_s12 = sld [smem:[#allocation13_spill]] }
 0x8af   : > { %s3354_s27 = sld [smem:[#allocation34_spill]] }
 0x8b3   : > { %s2260_s14 = sshll.u32 %s3351_s11, 4 }
 0x8b4   : > { %s3356_s0 = sand.u32 1, %s3352_s12  }
 0x8b5   : > { %s3355_s8 = smov %s3354_s27  ;;  %s2006_s28 = scalar_lea.hbm %s3354_s27, %s2260_s14 }
 0x8b6   : > { %s2009_s29 = sshll.u32 %s2006_s28, 4  ;;  %s1991_s20 = scalar_lea.sflag [#allocation10], %s3356_s0  ;;  %s2010_s29 = int_to_ptr.hbm [resolvable:$true] %s2009_s29 }
 0x8b7   : > { %s2479_s1 = sshra.s32 %s2010_s29, 4  ;;  %s2485_s25 = scalar_lea.hbm %s3355_s8, 32  ;;  %s2480_s1 = int_to_ptr.hbm [resolvable:$true] %s2479_s1 }
 0x8b8   : > { %s2481_s2 = scalar_lea.hbm %s2480_s1, 16  ;;  %p2486_p6 = scmp.lt.s32.totalorder %s2480_s1, %s3355_s8 }
 0x8b9   : > { %p2482_p2 = scmp.ne.s32.totalorder %s2480_s1, %s2481_s2  ;;  %p2487_p7 = scmp.lt.s32.totalorder %s2485_s25, %s2481_s2 }
 0x8bb   : > { %p2483_p4 = pnand %p2482_p2, %p2729_p3  ;;  %p2488_p8 = por %p2487_p7, %p2486_p6 }
 0x8bd   : > { %p2484_p5 = pneg %p2483_p4 }
 0x8bf   : > { %p2489_p10 = pnand %p2488_p8, %p2484_p5 }
 0x8c1   : > { %2492 = shalt.err (!%p2489_p10)
}
 0x8c2   : > { %s2584_s19 = smov 128  }
 0x8c3   : > { %2261 = dma.vmem_to_hbm [thread:$0]  (%p2729_p3), %s2008_s30, 256, %s2010_s29, %s1991_s20, %s2584_s19, %s2584_s19, %s2576_s15  }
 0x8c4 PF: > { %s3357_s12 = sld [smem:[#allocation18_spill]] }
 0x8c5   : > { %s3358_s14 = sld [smem:[#allocation12_spill]] }
 0x8ca   : > { %p2267_p11 = scmp.ge.s32.totalorder %s3357_s12, 2 }
 0x8cb   : > { %s2036_s18 = sand.u32 1, %s3358_s14  }
 0x8cc   : > { %p2264_p12 = pnand %p2267_p11, %p2739_p9  ;;  %s2037_s27 = scalar_lea.sflag [#allocation10], %s2036_s18 }
 0x8ce   : > { %p2265_p13 = pneg %p2264_p12 }
 0x8d0   : > { %2526 = dma.done.wait (%p2265_p13), %s2037_s27, 256  }
 0x8d1   : > { %2528 = vsyncadd (%p2265_p13), %s2037_s27, 4294967040  ;;  %s32_s20 = sadd.s32 1, %s3357_s12   ;;  %s3360_s27 = sld [smem:[#allocation13_spill]] }
 0x8d2   : > { %p29_p0 = scmp.ge.s32.totalorder %s32_s20, 10   ;;  %s3361_s28 = sld [smem:[#allocation14_spill]] }
 0x8d3   : > { %s3362_s29 = sld [smem:[#allocation23_spill]] }
 0x8d4   : > { %s3363_s30 = sld [smem:[#allocation16_spill]]  ;;  %31 = sbr.rel (!%p29_p0) target bundleno = 17 (0x11), region = 149 }
 0x8d5   : > { %s3364_s0 = sld [smem:[#allocation17_spill]] }
 0x8d6   : > { %s3365_s19 = sld [smem:[#allocation19_spill]] }
 0x8d7   : > { %s3366_s1 = sld [smem:[#allocation21_spill]] }
 0x8d9   :  { %2043 = vsyncpa [#allocation10], 1 }
 0x8da   :  { %2045 = vsyncpa [#allocation10 + $0x1], 1 }

</bundles_post_ra>
